<compile_context>
chip_gen: v6e
topology: v6e:2x2x1
jax: 0.10.0
libtpu: 0.0.40
codegen_flags: <defaults>
</compile_context>

<pallas_src>
import jax
import jax.numpy as jnp
import numpy as np
from jax import lax
from jax.experimental import pallas as pl
from jax.experimental.pallas import tpu as pltpu


# ----------------------------- Pallas kernel --------------------------------
def _one_neuron_kernel(x_ref,        # (T, B, 1)  f32  time-major input (gate precompute)
                       x_bt_ref,     # (B, T)     f32  lane-dense copy (softplus/output path)
                       pack_ref,     # (8, 4H)    f32  packed small params (see wrapper)
                       whh_ref,      # (H, 4H)    f32 (or bf16)  W_hh^T
                       out_ref,      # (B, T)     f32  outputs (lane-dense; wrapper transposes)
                       g_ref,        # (B, T)     f32  gains
                       pg_ref,       # (T, B, 4H) f32  scratch: x_t*W_ih_x + (b_ih + b_hh)
                       rg_ref):      # (T, B, 4H) f32  scratch: sp_{t-1}*W_ih_r
    T, B, _ = x_ref.shape
    H = whh_ref.shape[0]

    # ---- unpack the packed parameter tile (static slices are free views) ----
    wih_x = pack_ref[0:1, :]            # (1, 4H)  input column of W_ih^T
    wih_r = pack_ref[1:2, :]            # (1, 4H)  recurrent (prev-output) column of W_ih^T
    b_gates = pack_ref[2:3, :]          # (1, 4H)  b_ih + b_hh
    wlo = pack_ref[3:4, 0:H]            # (1, H)   linearLSTM weight
    blo = pack_ref[4:5, 0:1]            # (1, 1)   linearLSTM bias
    a_lin = pack_ref[4:5, 1:2]          # (1, 1)   collapsed hiddenGamma∘linearHidden slope
    b_lin = pack_ref[4:5, 2:3]          # (1, 1)   collapsed intercept
    whh = whh_ref[...]                  # (H, 4H)  loop-invariant, hoisted

    # ---- time-independent pathway, vectorized over all T --------------------
    # Naive softplus form log(1 + exp(lin - 1)) kept verbatim from the torch module
    # (it overflows for lin - 1 >~ 88 exactly like the reference would).
    sp_bt = jnp.log(1.0 + jnp.exp(a_lin * x_bt_ref[...] + b_lin - 1.0))     # (B, T)

    # ---- precompute everything in the gate pre-activation that does not depend
    # on the recurrent state:
    #   gates_t = [x_t*W_ih_x + b] + g_mult * [sp_{t-1}*W_ih_r] + h_{t-1} @ W_hh^T
    # where out_{t-1} = g_mult * sp_{t-1}; only the per-batch scalar g_mult stays
    # in the loop carry, so the loop never touches x, sp or out.
    x3 = x_ref[...]                                                          # (T, B, 1)
    pg_ref[...] = x3 * wih_x[None] + b_gates[None]                           # (T, B, 4H)
    if T > 1:
        sp3 = jnp.log(1.0 + jnp.exp(a_lin * x3 + b_lin - 1.0))              # (T, B, 1)
        rg_ref[1:T] = sp3[:T - 1] * wih_r[None]                              # rows 1..T-1
    # rg_ref row 0 is never read (recurrence starts at t = 1).

    t_iota = lax.broadcasted_iota(jnp.int32, (B, T), 1)                      # hoisted

    def body(t, carry):
        # carry: h_{t-1}, c_{t-1},
        #        g_mult  = multiplier of sp_{t-1} inside out_{t-1} (g_{t-2}, or 1),
        #        g_last  = g_{t-1},
        #        g_acc   = all g's produced so far, lane t holds g_t, shape (B, T)
        h, c, g_mult, g_last, g_acc = carry

        # LSTMCell on cat(x_t, out_{t-1}); only the (B,H)x(H,4H) product hits the MXU.
        # TODO(synk): hold W_hh resident in MXU weight regs across iterations via
        # pltpu.matmul_push_rhs/matmul_acc_lhs once verified on hardware.
        gates = (pg_ref[t] + g_mult * rg_ref[t]
                 + jnp.dot(h.astype(whh.dtype), whh,
                           preferred_element_type=jnp.float32))              # (B, 4H)
        sig = jax.nn.sigmoid(gates)            # one full-tile EUP pass
        tnh = jnp.tanh(gates)                  # one full-tile EUP pass
        i_g = sig[:, 0:H]
        f_g = sig[:, H:2 * H]
        g_g = tnh[:, 2 * H:3 * H]
        o_g = sig[:, 3 * H:4 * H]
        c_new = f_g * c + i_g * g_g
        h_new = o_g * jnp.tanh(c_new)

        # g_t = linearLSTM(h_t): elementwise mul + lane reduce (VPU + XLU, no MXU).
        g_t = jnp.sum(h_new * wlo, axis=-1, keepdims=True) + blo             # (B, 1)
        # Stash g_t at lane t of the carried (B, T) accumulator: one vselect, no
        # VMEM traffic and no dynamic stores inside the serial chain.
        g_acc = jnp.where(t_iota == t, g_t, g_acc)
        return h_new, c_new, g_last, g_t, g_acc

    init = (jnp.zeros((B, H), jnp.float32),              # h_0
            jnp.zeros((B, H), jnp.float32),              # c_0
            jnp.ones((B, 1), jnp.float32),               # multiplier for sp_0 (g_0 = 1)
            jnp.ones((B, 1), jnp.float32),               # g_0 = 1
            (t_iota == 0).astype(jnp.float32))           # g_acc with column 0 = g_0 = 1
    carry = lax.fori_loop(1, T, body, init,
                          unroll=True if (T - 1) <= 32 else 8)
    g_all = carry[4]                                     # (B, T)

    # out_t = g_{t-1} * sp_t (with g_{-1} := 1): one vectorized pass, dense stores.
    if T > 1:
        g_shift = jnp.concatenate(
            [jnp.ones((B, 1), jnp.float32), g_all[:, :T - 1]], axis=1)       # (B, T)
    else:
        g_shift = jnp.ones((B, 1), jnp.float32)
    out_ref[...] = g_shift * sp_bt
    g_ref[...] = g_all


# ------------------------------ wrapper --------------------------------------
def network_one_neuron_forward(x, params, *, mxu_bf16=False):
    """x: (T, B, D=1) f32.  Returns (out (T,B,1), g (T,B)), matching the torch forward."""
    T, B, D = x.shape
    assert D == 1, "NetworkOneNeuron semantics require input_dim == 1"
    H = params["w_hh"].shape[1]
    H4 = 4 * H
    f32 = jnp.float32
    x = x.astype(f32)

    # --- re-layout / fold parameters (tiny, done once in XLA) ----------------
    wih_t = params["w_ih"].T.astype(f32)                          # (2, 4H)
    wih_x = wih_t[0]                                              # (4H,)  x column
    wih_r = wih_t[1]                                              # (4H,)  out_{t-1} column
    b_gates = (params["b_ih"] + params["b_hh"]).astype(f32)       # (4H,)
    whh_t = params["w_hh"].T.astype(f32)                          # (H, 4H)
    wlo = params["w_lstm_out"].reshape(-1).astype(f32)            # (H,)
    blo = params["b_lstm_out"].reshape(()).astype(f32)
    # Collapse Linear(1,10) -> Linear(10,1) (no nonlinearity between) to lin = a*x + b.
    a_lin = jnp.dot(params["w_gamma"].reshape(-1),
                    params["w_hid"].reshape(-1)).astype(f32)
    b_lin = (jnp.dot(params["w_gamma"].reshape(-1), params["b_hid"].reshape(-1))
             + params["b_gamma"].reshape(())).astype(f32)

    # Pack every sub-(8,128) parameter into a single (8, 4H) f32 tile (1 DMA, not 9).
    pack = jnp.zeros((8, H4), f32)
    pack = pack.at[0, :].set(wih_x)
    pack = pack.at[1, :].set(wih_r)
    pack = pack.at[2, :].set(b_gates)
    pack = pack.at[3, :H].set(wlo)
    pack = pack.at[4, 0].set(blo)
    pack = pack.at[4, 1].set(a_lin)
    pack = pack.at[4, 2].set(b_lin)

    # Optional: bf16 MXU operands (default off to keep exact f32 recurrence numerics).
    whh_in = whh_t.astype(jnp.bfloat16) if mxu_bf16 else whh_t

    # x in two layouts so the kernel needs no in-kernel relayout/reshape:
    #   (T,B,1) for the per-step gate precompute, (B,T) lane-dense for the output path.
    x_bt = x[:, :, 0].T                                           # (B, T)

    vmem = pl.BlockSpec(memory_space=pltpu.MemorySpace.VMEM)
    out_bt, g_bt = pl.pallas_call(
        _one_neuron_kernel,
        out_shape=(jax.ShapeDtypeStruct((B, T), f32),
                   jax.ShapeDtypeStruct((B, T), f32)),
        in_specs=[vmem, vmem, vmem, vmem],
        out_specs=(vmem, vmem),
        scratch_shapes=[pltpu.VMEM((T, B, H4), f32),
                        pltpu.VMEM((T, B, H4), f32)],
    )(x, x_bt, pack, whh_in)
    # TODO(synk): for very long sequences, chunk the time axis (grid over T-chunks with
    # h/c/g carried in VMEM scratch, pl.Buffered pipelining of x/out/g chunks and an
    # explicit vmem_limit_bytes) so VMEM stays bounded; unnecessary at these shapes.

    out = out_bt.T[:, :, None]                                    # (T, B, 1)
    g = g_bt.T                                                    # (T, B)
    return out, g


# -------------------------- pure-JAX reference --------------------------------
def reference_forward(x, p):
    T, B, D = x.shape
    H = p["w_hh"].shape[1]
    h = jnp.zeros((B, H), jnp.float32)
    c = jnp.zeros((B, H), jnp.float32)
    outs, gs = [], []
    for i in range(T):
        out_hid = x[i] @ p["w_hid"].T + p["b_hid"]
        lin_out = (out_hid @ p["w_gamma"].T + p["b_gamma"]).reshape(-1)
        sp = jnp.log(1.0 + jnp.exp(lin_out - 1.0))
        if i > 0:
            comb = jnp.concatenate([x[i], outs[i - 1]], axis=1)
            gates = comb @ p["w_ih"].T + p["b_ih"] + h @ p["w_hh"].T + p["b_hh"]
            i_g = jax.nn.sigmoid(gates[:, :H])
            f_g = jax.nn.sigmoid(gates[:, H:2 * H])
            g_g = jnp.tanh(gates[:, 2 * H:3 * H])
            o_g = jax.nn.sigmoid(gates[:, 3 * H:])
            c = f_g * c + i_g * g_g
            h = o_g * jnp.tanh(c)
            g_t = (h @ p["w_lstm_out"].T + p["b_lstm_out"])[:, 0]
            out = gs[i - 1] * sp
        else:
            g_t = jnp.ones((B,), jnp.float32)
            out = g_t * sp
        outs.append(out.reshape(-1, 1))
        gs.append(g_t)
    return jnp.stack(outs, 0), jnp.stack(gs, 0)


# ------------------------------ params ----------------------------------------
def init_params(key, input_dim, hidden_size):
    def uni(k, shape, fan_in):
        bound = 1.0 / np.sqrt(fan_in)
        return jax.random.uniform(k, shape, jnp.float32, -bound, bound)

    ks = jax.random.split(key, 10)
    H, D = hidden_size, input_dim
    return {
        "w_ih": uni(ks[0], (4 * H, 2 * D), H),
        "w_hh": uni(ks[1], (4 * H, H), H),
        "b_ih": uni(ks[2], (4 * H,), H),
        "b_hh": uni(ks[3], (4 * H,), H),
        "w_lstm_out": uni(ks[4], (1, H), H),
        "b_lstm_out": uni(ks[5], (1,), H),
        "w_hid": uni(ks[6], (10, D), D),
        "b_hid": uni(ks[7], (10,), D),
        "w_gamma": uni(ks[8], (D, 10), 10),
        "b_gamma": uni(ks[9], (D,), 10),
    }


if __name__ == "__main__":
    T, B, D, H = 8, 8, 1, 32

    key = jax.random.PRNGKey(0)
    k_x, k_p = jax.random.split(key)
    x = jax.random.normal(k_x, (T, B, D), jnp.float32)
    params = init_params(k_p, D, H)

    out, g = network_one_neuron_forward(x, params)
    out, g = jax.block_until_ready((out, g))

    out_exp, g_exp = reference_forward(x, params)
    np.testing.assert_allclose(np.asarray(out), np.asarray(out_exp), rtol=1e-4, atol=1e-4)
    np.testing.assert_allclose(np.asarray(g), np.asarray(g_exp), rtol=1e-4, atol=1e-4)

    assert out.shape == (T, B, 1) and g.shape == (T, B)
    print("KERNEL_OK")
</pallas_src>

<mosaic_0001>
module attributes {stable_mosaic.version = 11 : i64} {
  func.func @_one_neuron_kernel(%arg0: memref<8x8x1xf32, #tpu.memory_space<vmem>>, %arg1: memref<8x8xf32, #tpu.memory_space<vmem>>, %arg2: memref<8x128xf32, #tpu.memory_space<vmem>>, %arg3: memref<32x128xf32, #tpu.memory_space<vmem>>, %arg4: memref<8x8xf32, #tpu.memory_space<vmem>>, %arg5: memref<8x8xf32, #tpu.memory_space<vmem>>, %arg6: memref<8x8x128xf32, #tpu.memory_space<vmem>>, %arg7: memref<8x8x128xf32, #tpu.memory_space<vmem>>) attributes {dimension_semantics = [], scalar_prefetch = 0 : i64, scratch_operands = 2 : i64, tpu.core_type = #tpu.core_type<tc>} {
    %c0 = arith.constant 0 : index
    %c0_0 = arith.constant 0 : index
    %0 = vector.load %arg2[%c0, %c0_0] : memref<8x128xf32, #tpu.memory_space<vmem>>, vector<1x128xf32>
    %c1 = arith.constant 1 : index
    %c0_1 = arith.constant 0 : index
    %1 = vector.load %arg2[%c1, %c0_1] : memref<8x128xf32, #tpu.memory_space<vmem>>, vector<1x128xf32>
    %c2 = arith.constant 2 : index
    %c0_2 = arith.constant 0 : index
    %2 = vector.load %arg2[%c2, %c0_2] : memref<8x128xf32, #tpu.memory_space<vmem>>, vector<1x128xf32>
    %c3 = arith.constant 3 : index
    %c0_3 = arith.constant 0 : index
    %3 = vector.load %arg2[%c3, %c0_3] : memref<8x128xf32, #tpu.memory_space<vmem>>, vector<1x32xf32>
    %c4 = arith.constant 4 : index
    %c0_4 = arith.constant 0 : index
    %4 = vector.load %arg2[%c4, %c0_4] : memref<8x128xf32, #tpu.memory_space<vmem>>, vector<1x1xf32>
    %c4_5 = arith.constant 4 : index
    %c1_6 = arith.constant 1 : index
    %5 = vector.load %arg2[%c4_5, %c1_6] : memref<8x128xf32, #tpu.memory_space<vmem>>, vector<1x1xf32>
    %c4_7 = arith.constant 4 : index
    %c2_8 = arith.constant 2 : index
    %6 = vector.load %arg2[%c4_7, %c2_8] : memref<8x128xf32, #tpu.memory_space<vmem>>, vector<1x1xf32>
    %c0_9 = arith.constant 0 : index
    %c0_10 = arith.constant 0 : index
    %7 = vector.load %arg3[%c0_9, %c0_10] : memref<32x128xf32, #tpu.memory_space<vmem>>, vector<32x128xf32>
    %c0_11 = arith.constant 0 : index
    %c0_12 = arith.constant 0 : index
    %8 = vector.load %arg1[%c0_11, %c0_12] : memref<8x8xf32, #tpu.memory_space<vmem>>, vector<8x8xf32>
    %9 = vector.broadcast %5 : vector<1x1xf32> to vector<8x8xf32>
    %10 = arith.mulf %9, %8 : vector<8x8xf32>
    %11 = vector.broadcast %6 : vector<1x1xf32> to vector<8x8xf32>
    %12 = arith.addf %10, %11 : vector<8x8xf32>
    %cst = arith.constant 1.000000e+00 : f32
    %13 = vector.broadcast %cst : f32 to vector<8x8xf32>
    %14 = arith.subf %12, %13 : vector<8x8xf32>
    %15 = math.exp %14 : vector<8x8xf32>
    %cst_13 = arith.constant 1.000000e+00 : f32
    %16 = vector.broadcast %cst_13 : f32 to vector<8x8xf32>
    %17 = arith.addf %16, %15 : vector<8x8xf32>
    %18 = math.log %17 : vector<8x8xf32>
    %c0_14 = arith.constant 0 : index
    %c0_15 = arith.constant 0 : index
    %c0_16 = arith.constant 0 : index
    %19 = vector.load %arg0[%c0_14, %c0_15, %c0_16] : memref<8x8x1xf32, #tpu.memory_space<vmem>>, vector<8x8x1xf32>
    %20 = vector.shape_cast %0 : vector<1x128xf32> to vector<1x1x128xf32>
    %21 = vector.broadcast %19 : vector<8x8x1xf32> to vector<8x8x128xf32>
    %22 = vector.broadcast %20 : vector<1x1x128xf32> to vector<8x8x128xf32>
    %23 = arith.mulf %21, %22 : vector<8x8x128xf32>
    %24 = vector.shape_cast %2 : vector<1x128xf32> to vector<1x1x128xf32>
    %25 = vector.broadcast %24 : vector<1x1x128xf32> to vector<8x8x128xf32>
    %26 = arith.addf %23, %25 : vector<8x8x128xf32>
    %c0_17 = arith.constant 0 : index
    %c0_18 = arith.constant 0 : index
    %c0_19 = arith.constant 0 : index
    %27 = vector.load %arg6[%c0_17, %c0_18, %c0_19] : memref<8x8x128xf32, #tpu.memory_space<vmem>>, vector<8x8x128xf32>
    tpu.vector_store %arg6[%c0_17, %c0_18, %c0_19], %26 {strides = array<i32>} : memref<8x8x128xf32, #tpu.memory_space<vmem>>, vector<8x8x128xf32>,
    %28 = vector.shape_cast %5 : vector<1x1xf32> to vector<1x1x1xf32>
    %29 = vector.broadcast %28 : vector<1x1x1xf32> to vector<8x8x1xf32>
    %30 = arith.mulf %29, %19 : vector<8x8x1xf32>
    %31 = vector.shape_cast %6 : vector<1x1xf32> to vector<1x1x1xf32>
    %32 = vector.broadcast %31 : vector<1x1x1xf32> to vector<8x8x1xf32>
    %33 = arith.addf %30, %32 : vector<8x8x1xf32>
    %cst_20 = arith.constant 1.000000e+00 : f32
    %34 = vector.broadcast %cst_20 : f32 to vector<8x8x1xf32>
    %35 = arith.subf %33, %34 : vector<8x8x1xf32>
    %36 = math.exp %35 : vector<8x8x1xf32>
    %cst_21 = arith.constant 1.000000e+00 : f32
    %37 = vector.broadcast %cst_21 : f32 to vector<8x8x1xf32>
    %38 = arith.addf %37, %36 : vector<8x8x1xf32>
    %39 = math.log %38 : vector<8x8x1xf32>
    %40 = vector.extract_strided_slice %39 {offsets = [0, 0, 0], sizes = [7, 8, 1], strides = [1, 1, 1]} : vector<8x8x1xf32> to vector<7x8x1xf32>
    %41 = vector.shape_cast %1 : vector<1x128xf32> to vector<1x1x128xf32>
    %42 = vector.broadcast %40 : vector<7x8x1xf32> to vector<7x8x128xf32>
    %43 = vector.broadcast %41 : vector<1x1x128xf32> to vector<7x8x128xf32>
    %44 = arith.mulf %42, %43 : vector<7x8x128xf32>
    %c1_22 = arith.constant 1 : index
    %c0_23 = arith.constant 0 : index
    %c0_24 = arith.constant 0 : index
    %45 = vector.load %arg7[%c1_22, %c0_23, %c0_24] : memref<8x8x128xf32, #tpu.memory_space<vmem>>, vector<7x8x128xf32>
    tpu.vector_store %arg7[%c1_22, %c0_23, %c0_24], %44 {strides = array<i32>} : memref<8x8x128xf32, #tpu.memory_space<vmem>>, vector<7x8x128xf32>,
    %46 = tpu.iota {dimensions = array<i32: 1>} : vector<8x8xi32>
    %cst_25 = arith.constant 0.000000e+00 : f32
    %47 = vector.broadcast %cst_25 : f32 to vector<8x32xf32>
    %cst_26 = arith.constant 0.000000e+00 : f32
    %48 = vector.broadcast %cst_26 : f32 to vector<8x32xf32>
    %cst_27 = arith.constant 1.000000e+00 : f32
    %49 = vector.broadcast %cst_27 : f32 to vector<8x1xf32>
    %cst_28 = arith.constant 1.000000e+00 : f32
    %50 = vector.broadcast %cst_28 : f32 to vector<8x1xf32>
    %c0_i32 = arith.constant 0 : i32
    %51 = vector.broadcast %c0_i32 : i32 to vector<8x8xi32>
    %52 = arith.cmpi eq, %46, %51 : vector<8x8xi32>
    %53 = arith.extui %52 : vector<8x8xi1> to vector<8x8xi32>
    %54 = arith.sitofp %53 : vector<8x8xi32> to vector<8x8xf32>
    %c1_i32 = arith.constant 1 : i32
    %55 = arith.index_cast %c1_i32 : i32 to index
    %c0_29 = arith.constant 0 : index
    %c0_30 = arith.constant 0 : index
    %56 = vector.load %arg6[%55, %c0_29, %c0_30] : memref<8x8x128xf32, #tpu.memory_space<vmem>>, vector<1x8x128xf32>
    %57 = vector.shape_cast %56 : vector<1x8x128xf32> to vector<8x128xf32>
    %58 = arith.index_cast %c1_i32 : i32 to index
    %c0_31 = arith.constant 0 : index
    %c0_32 = arith.constant 0 : index
    %59 = vector.load %arg7[%58, %c0_31, %c0_32] : memref<8x8x128xf32, #tpu.memory_space<vmem>>, vector<1x8x128xf32>
    %60 = vector.shape_cast %59 : vector<1x8x128xf32> to vector<8x128xf32>
    %61 = vector.broadcast %49 : vector<8x1xf32> to vector<8x128xf32>
    %62 = arith.mulf %61, %60 : vector<8x128xf32>
    %63 = arith.addf %57, %62 : vector<8x128xf32>
    %cst_33 = arith.constant dense<0.000000e+00> : vector<8x128xf32>
    %64 = tpu.matmul %47, %7, %cst_33 {dimension_numbers = #tpu.dot_dimension_numbers<[1], [0], [0], [1], [0, 0, 1, 1], [], []>} : vector<8x32xf32>, vector<32x128xf32>, vector<8x128xf32> -> vector<8x128xf32>
    %65 = arith.addf %63, %64 : vector<8x128xf32>
    %66 = arith.negf %65 : vector<8x128xf32>
    %67 = math.exp %66 : vector<8x128xf32>
    %cst_34 = arith.constant 1.000000e+00 : f32
    %68 = vector.broadcast %cst_34 : f32 to vector<8x128xf32>
    %69 = arith.addf %68, %67 : vector<8x128xf32>
    %70 = arith.divf %68, %69 : vector<8x128xf32>
    %71 = math.tanh %65 : vector<8x128xf32>
    %72 = vector.extract_strided_slice %70 {offsets = [0, 0], sizes = [8, 32], strides = [1, 1]} : vector<8x128xf32> to vector<8x32xf32>
    %73 = vector.extract_strided_slice %70 {offsets = [0, 32], sizes = [8, 32], strides = [1, 1]} : vector<8x128xf32> to vector<8x32xf32>
    %74 = vector.extract_strided_slice %71 {offsets = [0, 64], sizes = [8, 32], strides = [1, 1]} : vector<8x128xf32> to vector<8x32xf32>
    %75 = vector.extract_strided_slice %70 {offsets = [0, 96], sizes = [8, 32], strides = [1, 1]} : vector<8x128xf32> to vector<8x32xf32>
    %76 = arith.mulf %73, %48 : vector<8x32xf32>
    %77 = arith.mulf %72, %74 : vector<8x32xf32>
    %78 = arith.addf %76, %77 : vector<8x32xf32>
    %79 = math.tanh %78 : vector<8x32xf32>
    %80 = arith.mulf %75, %79 : vector<8x32xf32>
    %81 = vector.broadcast %3 : vector<1x32xf32> to vector<8x32xf32>
    %82 = arith.mulf %80, %81 : vector<8x32xf32>
    %cst_35 = arith.constant dense<0.000000e+00> : vector<8xf32>
    %83 = vector.multi_reduction <add>, %82, %cst_35 [1] : vector<8x32xf32> to vector<8xf32>
    %84 = vector.shape_cast %83 : vector<8xf32> to vector<8x1xf32>
    %85 = vector.broadcast %4 : vector<1x1xf32> to vector<8x1xf32>
    %86 = arith.addf %84, %85 : vector<8x1xf32>
    %87 = vector.broadcast %c1_i32 : i32 to vector<8x8xi32>
    %88 = arith.cmpi eq, %46, %87 : vector<8x8xi32>
    %89 = vector.shape_cast %86 : vector<8x1xf32> to vector<8x1xf32>
    %90 = vector.broadcast %89 : vector<8x1xf32> to vector<8x8xf32>
    %91 = arith.select %88, %90, %54 : vector<8x8xi1>, vector<8x8xf32>
    %c2_i32 = arith.constant 2 : i32
    %92 = arith.index_cast %c2_i32 : i32 to index
    %c0_36 = arith.constant 0 : index
    %c0_37 = arith.constant 0 : index
    %93 = vector.load %arg6[%92, %c0_36, %c0_37] : memref<8x8x128xf32, #tpu.memory_space<vmem>>, vector<1x8x128xf32>
    %94 = vector.shape_cast %93 : vector<1x8x128xf32> to vector<8x128xf32>
    %95 = arith.index_cast %c2_i32 : i32 to index
    %c0_38 = arith.constant 0 : index
    %c0_39 = arith.constant 0 : index
    %96 = vector.load %arg7[%95, %c0_38, %c0_39] : memref<8x8x128xf32, #tpu.memory_space<vmem>>, vector<1x8x128xf32>
    %97 = vector.shape_cast %96 : vector<1x8x128xf32> to vector<8x128xf32>
    %98 = vector.broadcast %50 : vector<8x1xf32> to vector<8x128xf32>
    %99 = arith.mulf %98, %97 : vector<8x128xf32>
    %100 = arith.addf %94, %99 : vector<8x128xf32>
    %cst_40 = arith.constant dense<0.000000e+00> : vector<8x128xf32>
    %101 = tpu.matmul %80, %7, %cst_40 {dimension_numbers = #tpu.dot_dimension_numbers<[1], [0], [0], [1], [0, 0, 1, 1], [], []>} : vector<8x32xf32>, vector<32x128xf32>, vector<8x128xf32> -> vector<8x128xf32>
    %102 = arith.addf %100, %101 : vector<8x128xf32>
    %103 = arith.negf %102 : vector<8x128xf32>
    %104 = math.exp %103 : vector<8x128xf32>
    %cst_41 = arith.constant 1.000000e+00 : f32
    %105 = vector.broadcast %cst_41 : f32 to vector<8x128xf32>
    %106 = arith.addf %105, %104 : vector<8x128xf32>
    %107 = arith.divf %105, %106 : vector<8x128xf32>
    %108 = math.tanh %102 : vector<8x128xf32>
    %109 = vector.extract_strided_slice %107 {offsets = [0, 0], sizes = [8, 32], strides = [1, 1]} : vector<8x128xf32> to vector<8x32xf32>
    %110 = vector.extract_strided_slice %107 {offsets = [0, 32], sizes = [8, 32], strides = [1, 1]} : vector<8x128xf32> to vector<8x32xf32>
    %111 = vector.extract_strided_slice %108 {offsets = [0, 64], sizes = [8, 32], strides = [1, 1]} : vector<8x128xf32> to vector<8x32xf32>
    %112 = vector.extract_strided_slice %107 {offsets = [0, 96], sizes = [8, 32], strides = [1, 1]} : vector<8x128xf32> to vector<8x32xf32>
    %113 = arith.mulf %110, %78 : vector<8x32xf32>
    %114 = arith.mulf %109, %111 : vector<8x32xf32>
    %115 = arith.addf %113, %114 : vector<8x32xf32>
    %116 = math.tanh %115 : vector<8x32xf32>
    %117 = arith.mulf %112, %116 : vector<8x32xf32>
    %118 = vector.broadcast %3 : vector<1x32xf32> to vector<8x32xf32>
    %119 = arith.mulf %117, %118 : vector<8x32xf32>
    %cst_42 = arith.constant dense<0.000000e+00> : vector<8xf32>
    %120 = vector.multi_reduction <add>, %119, %cst_42 [1] : vector<8x32xf32> to vector<8xf32>
    %121 = vector.shape_cast %120 : vector<8xf32> to vector<8x1xf32>
    %122 = vector.broadcast %4 : vector<1x1xf32> to vector<8x1xf32>
    %123 = arith.addf %121, %122 : vector<8x1xf32>
    %124 = vector.broadcast %c2_i32 : i32 to vector<8x8xi32>
    %125 = arith.cmpi eq, %46, %124 : vector<8x8xi32>
    %126 = vector.shape_cast %123 : vector<8x1xf32> to vector<8x1xf32>
    %127 = vector.broadcast %126 : vector<8x1xf32> to vector<8x8xf32>
    %128 = arith.select %125, %127, %91 : vector<8x8xi1>, vector<8x8xf32>
    %c3_i32 = arith.constant 3 : i32
    %129 = arith.index_cast %c3_i32 : i32 to index
    %c0_43 = arith.constant 0 : index
    %c0_44 = arith.constant 0 : index
    %130 = vector.load %arg6[%129, %c0_43, %c0_44] : memref<8x8x128xf32, #tpu.memory_space<vmem>>, vector<1x8x128xf32>
    %131 = vector.shape_cast %130 : vector<1x8x128xf32> to vector<8x128xf32>
    %132 = arith.index_cast %c3_i32 : i32 to index
    %c0_45 = arith.constant 0 : index
    %c0_46 = arith.constant 0 : index
    %133 = vector.load %arg7[%132, %c0_45, %c0_46] : memref<8x8x128xf32, #tpu.memory_space<vmem>>, vector<1x8x128xf32>
    %134 = vector.shape_cast %133 : vector<1x8x128xf32> to vector<8x128xf32>
    %135 = vector.broadcast %86 : vector<8x1xf32> to vector<8x128xf32>
    %136 = arith.mulf %135, %134 : vector<8x128xf32>
    %137 = arith.addf %131, %136 : vector<8x128xf32>
    %cst_47 = arith.constant dense<0.000000e+00> : vector<8x128xf32>
    %138 = tpu.matmul %117, %7, %cst_47 {dimension_numbers = #tpu.dot_dimension_numbers<[1], [0], [0], [1], [0, 0, 1, 1], [], []>} : vector<8x32xf32>, vector<32x128xf32>, vector<8x128xf32> -> vector<8x128xf32>
    %139 = arith.addf %137, %138 : vector<8x128xf32>
    %140 = arith.negf %139 : vector<8x128xf32>
    %141 = math.exp %140 : vector<8x128xf32>
    %cst_48 = arith.constant 1.000000e+00 : f32
    %142 = vector.broadcast %cst_48 : f32 to vector<8x128xf32>
    %143 = arith.addf %142, %141 : vector<8x128xf32>
    %144 = arith.divf %142, %143 : vector<8x128xf32>
    %145 = math.tanh %139 : vector<8x128xf32>
    %146 = vector.extract_strided_slice %144 {offsets = [0, 0], sizes = [8, 32], strides = [1, 1]} : vector<8x128xf32> to vector<8x32xf32>
    %147 = vector.extract_strided_slice %144 {offsets = [0, 32], sizes = [8, 32], strides = [1, 1]} : vector<8x128xf32> to vector<8x32xf32>
    %148 = vector.extract_strided_slice %145 {offsets = [0, 64], sizes = [8, 32], strides = [1, 1]} : vector<8x128xf32> to vector<8x32xf32>
    %149 = vector.extract_strided_slice %144 {offsets = [0, 96], sizes = [8, 32], strides = [1, 1]} : vector<8x128xf32> to vector<8x32xf32>
    %150 = arith.mulf %147, %115 : vector<8x32xf32>
    %151 = arith.mulf %146, %148 : vector<8x32xf32>
    %152 = arith.addf %150, %151 : vector<8x32xf32>
    %153 = math.tanh %152 : vector<8x32xf32>
    %154 = arith.mulf %149, %153 : vector<8x32xf32>
    %155 = vector.broadcast %3 : vector<1x32xf32> to vector<8x32xf32>
    %156 = arith.mulf %154, %155 : vector<8x32xf32>
    %cst_49 = arith.constant dense<0.000000e+00> : vector<8xf32>
    %157 = vector.multi_reduction <add>, %156, %cst_49 [1] : vector<8x32xf32> to vector<8xf32>
    %158 = vector.shape_cast %157 : vector<8xf32> to vector<8x1xf32>
    %159 = vector.broadcast %4 : vector<1x1xf32> to vector<8x1xf32>
    %160 = arith.addf %158, %159 : vector<8x1xf32>
    %161 = vector.broadcast %c3_i32 : i32 to vector<8x8xi32>
    %162 = arith.cmpi eq, %46, %161 : vector<8x8xi32>
    %163 = vector.shape_cast %160 : vector<8x1xf32> to vector<8x1xf32>
    %164 = vector.broadcast %163 : vector<8x1xf32> to vector<8x8xf32>
    %165 = arith.select %162, %164, %128 : vector<8x8xi1>, vector<8x8xf32>
    %c4_i32 = arith.constant 4 : i32
    %166 = arith.index_cast %c4_i32 : i32 to index
    %c0_50 = arith.constant 0 : index
    %c0_51 = arith.constant 0 : index
    %167 = vector.load %arg6[%166, %c0_50, %c0_51] : memref<8x8x128xf32, #tpu.memory_space<vmem>>, vector<1x8x128xf32>
    %168 = vector.shape_cast %167 : vector<1x8x128xf32> to vector<8x128xf32>
    %169 = arith.index_cast %c4_i32 : i32 to index
    %c0_52 = arith.constant 0 : index
    %c0_53 = arith.constant 0 : index
    %170 = vector.load %arg7[%169, %c0_52, %c0_53] : memref<8x8x128xf32, #tpu.memory_space<vmem>>, vector<1x8x128xf32>
    %171 = vector.shape_cast %170 : vector<1x8x128xf32> to vector<8x128xf32>
    %172 = vector.broadcast %123 : vector<8x1xf32> to vector<8x128xf32>
    %173 = arith.mulf %172, %171 : vector<8x128xf32>
    %174 = arith.addf %168, %173 : vector<8x128xf32>
    %cst_54 = arith.constant dense<0.000000e+00> : vector<8x128xf32>
    %175 = tpu.matmul %154, %7, %cst_54 {dimension_numbers = #tpu.dot_dimension_numbers<[1], [0], [0], [1], [0, 0, 1, 1], [], []>} : vector<8x32xf32>, vector<32x128xf32>, vector<8x128xf32> -> vector<8x128xf32>
    %176 = arith.addf %174, %175 : vector<8x128xf32>
    %177 = arith.negf %176 : vector<8x128xf32>
    %178 = math.exp %177 : vector<8x128xf32>
    %cst_55 = arith.constant 1.000000e+00 : f32
    %179 = vector.broadcast %cst_55 : f32 to vector<8x128xf32>
    %180 = arith.addf %179, %178 : vector<8x128xf32>
    %181 = arith.divf %179, %180 : vector<8x128xf32>
    %182 = math.tanh %176 : vector<8x128xf32>
    %183 = vector.extract_strided_slice %181 {offsets = [0, 0], sizes = [8, 32], strides = [1, 1]} : vector<8x128xf32> to vector<8x32xf32>
    %184 = vector.extract_strided_slice %181 {offsets = [0, 32], sizes = [8, 32], strides = [1, 1]} : vector<8x128xf32> to vector<8x32xf32>
    %185 = vector.extract_strided_slice %182 {offsets = [0, 64], sizes = [8, 32], strides = [1, 1]} : vector<8x128xf32> to vector<8x32xf32>
    %186 = vector.extract_strided_slice %181 {offsets = [0, 96], sizes = [8, 32], strides = [1, 1]} : vector<8x128xf32> to vector<8x32xf32>
    %187 = arith.mulf %184, %152 : vector<8x32xf32>
    %188 = arith.mulf %183, %185 : vector<8x32xf32>
    %189 = arith.addf %187, %188 : vector<8x32xf32>
    %190 = math.tanh %189 : vector<8x32xf32>
    %191 = arith.mulf %186, %190 : vector<8x32xf32>
    %192 = vector.broadcast %3 : vector<1x32xf32> to vector<8x32xf32>
    %193 = arith.mulf %191, %192 : vector<8x32xf32>
    %cst_56 = arith.constant dense<0.000000e+00> : vector<8xf32>
    %194 = vector.multi_reduction <add>, %193, %cst_56 [1] : vector<8x32xf32> to vector<8xf32>
    %195 = vector.shape_cast %194 : vector<8xf32> to vector<8x1xf32>
    %196 = vector.broadcast %4 : vector<1x1xf32> to vector<8x1xf32>
    %197 = arith.addf %195, %196 : vector<8x1xf32>
    %198 = vector.broadcast %c4_i32 : i32 to vector<8x8xi32>
    %199 = arith.cmpi eq, %46, %198 : vector<8x8xi32>
    %200 = vector.shape_cast %197 : vector<8x1xf32> to vector<8x1xf32>
    %201 = vector.broadcast %200 : vector<8x1xf32> to vector<8x8xf32>
    %202 = arith.select %199, %201, %165 : vector<8x8xi1>, vector<8x8xf32>
    %c5_i32 = arith.constant 5 : i32
    %203 = arith.index_cast %c5_i32 : i32 to index
    %c0_57 = arith.constant 0 : index
    %c0_58 = arith.constant 0 : index
    %204 = vector.load %arg6[%203, %c0_57, %c0_58] : memref<8x8x128xf32, #tpu.memory_space<vmem>>, vector<1x8x128xf32>
    %205 = vector.shape_cast %204 : vector<1x8x128xf32> to vector<8x128xf32>
    %206 = arith.index_cast %c5_i32 : i32 to index
    %c0_59 = arith.constant 0 : index
    %c0_60 = arith.constant 0 : index
    %207 = vector.load %arg7[%206, %c0_59, %c0_60] : memref<8x8x128xf32, #tpu.memory_space<vmem>>, vector<1x8x128xf32>
    %208 = vector.shape_cast %207 : vector<1x8x128xf32> to vector<8x128xf32>
    %209 = vector.broadcast %160 : vector<8x1xf32> to vector<8x128xf32>
    %210 = arith.mulf %209, %208 : vector<8x128xf32>
    %211 = arith.addf %205, %210 : vector<8x128xf32>
    %cst_61 = arith.constant dense<0.000000e+00> : vector<8x128xf32>
    %212 = tpu.matmul %191, %7, %cst_61 {dimension_numbers = #tpu.dot_dimension_numbers<[1], [0], [0], [1], [0, 0, 1, 1], [], []>} : vector<8x32xf32>, vector<32x128xf32>, vector<8x128xf32> -> vector<8x128xf32>
    %213 = arith.addf %211, %212 : vector<8x128xf32>
    %214 = arith.negf %213 : vector<8x128xf32>
    %215 = math.exp %214 : vector<8x128xf32>
    %cst_62 = arith.constant 1.000000e+00 : f32
    %216 = vector.broadcast %cst_62 : f32 to vector<8x128xf32>
    %217 = arith.addf %216, %215 : vector<8x128xf32>
    %218 = arith.divf %216, %217 : vector<8x128xf32>
    %219 = math.tanh %213 : vector<8x128xf32>
    %220 = vector.extract_strided_slice %218 {offsets = [0, 0], sizes = [8, 32], strides = [1, 1]} : vector<8x128xf32> to vector<8x32xf32>
    %221 = vector.extract_strided_slice %218 {offsets = [0, 32], sizes = [8, 32], strides = [1, 1]} : vector<8x128xf32> to vector<8x32xf32>
    %222 = vector.extract_strided_slice %219 {offsets = [0, 64], sizes = [8, 32], strides = [1, 1]} : vector<8x128xf32> to vector<8x32xf32>
    %223 = vector.extract_strided_slice %218 {offsets = [0, 96], sizes = [8, 32], strides = [1, 1]} : vector<8x128xf32> to vector<8x32xf32>
    %224 = arith.mulf %221, %189 : vector<8x32xf32>
    %225 = arith.mulf %220, %222 : vector<8x32xf32>
    %226 = arith.addf %224, %225 : vector<8x32xf32>
    %227 = math.tanh %226 : vector<8x32xf32>
    %228 = arith.mulf %223, %227 : vector<8x32xf32>
    %229 = vector.broadcast %3 : vector<1x32xf32> to vector<8x32xf32>
    %230 = arith.mulf %228, %229 : vector<8x32xf32>
    %cst_63 = arith.constant dense<0.000000e+00> : vector<8xf32>
    %231 = vector.multi_reduction <add>, %230, %cst_63 [1] : vector<8x32xf32> to vector<8xf32>
    %232 = vector.shape_cast %231 : vector<8xf32> to vector<8x1xf32>
    %233 = vector.broadcast %4 : vector<1x1xf32> to vector<8x1xf32>
    %234 = arith.addf %232, %233 : vector<8x1xf32>
    %235 = vector.broadcast %c5_i32 : i32 to vector<8x8xi32>
    %236 = arith.cmpi eq, %46, %235 : vector<8x8xi32>
    %237 = vector.shape_cast %234 : vector<8x1xf32> to vector<8x1xf32>
    %238 = vector.broadcast %237 : vector<8x1xf32> to vector<8x8xf32>
    %239 = arith.select %236, %238, %202 : vector<8x8xi1>, vector<8x8xf32>
    %c6_i32 = arith.constant 6 : i32
    %240 = arith.index_cast %c6_i32 : i32 to index
    %c0_64 = arith.constant 0 : index
    %c0_65 = arith.constant 0 : index
    %241 = vector.load %arg6[%240, %c0_64, %c0_65] : memref<8x8x128xf32, #tpu.memory_space<vmem>>, vector<1x8x128xf32>
    %242 = vector.shape_cast %241 : vector<1x8x128xf32> to vector<8x128xf32>
    %243 = arith.index_cast %c6_i32 : i32 to index
    %c0_66 = arith.constant 0 : index
    %c0_67 = arith.constant 0 : index
    %244 = vector.load %arg7[%243, %c0_66, %c0_67] : memref<8x8x128xf32, #tpu.memory_space<vmem>>, vector<1x8x128xf32>
    %245 = vector.shape_cast %244 : vector<1x8x128xf32> to vector<8x128xf32>
    %246 = vector.broadcast %197 : vector<8x1xf32> to vector<8x128xf32>
    %247 = arith.mulf %246, %245 : vector<8x128xf32>
    %248 = arith.addf %242, %247 : vector<8x128xf32>
    %cst_68 = arith.constant dense<0.000000e+00> : vector<8x128xf32>
    %249 = tpu.matmul %228, %7, %cst_68 {dimension_numbers = #tpu.dot_dimension_numbers<[1], [0], [0], [1], [0, 0, 1, 1], [], []>} : vector<8x32xf32>, vector<32x128xf32>, vector<8x128xf32> -> vector<8x128xf32>
    %250 = arith.addf %248, %249 : vector<8x128xf32>
    %251 = arith.negf %250 : vector<8x128xf32>
    %252 = math.exp %251 : vector<8x128xf32>
    %cst_69 = arith.constant 1.000000e+00 : f32
    %253 = vector.broadcast %cst_69 : f32 to vector<8x128xf32>
    %254 = arith.addf %253, %252 : vector<8x128xf32>
    %255 = arith.divf %253, %254 : vector<8x128xf32>
    %256 = math.tanh %250 : vector<8x128xf32>
    %257 = vector.extract_strided_slice %255 {offsets = [0, 0], sizes = [8, 32], strides = [1, 1]} : vector<8x128xf32> to vector<8x32xf32>
    %258 = vector.extract_strided_slice %255 {offsets = [0, 32], sizes = [8, 32], strides = [1, 1]} : vector<8x128xf32> to vector<8x32xf32>
    %259 = vector.extract_strided_slice %256 {offsets = [0, 64], sizes = [8, 32], strides = [1, 1]} : vector<8x128xf32> to vector<8x32xf32>
    %260 = vector.extract_strided_slice %255 {offsets = [0, 96], sizes = [8, 32], strides = [1, 1]} : vector<8x128xf32> to vector<8x32xf32>
    %261 = arith.mulf %258, %226 : vector<8x32xf32>
    %262 = arith.mulf %257, %259 : vector<8x32xf32>
    %263 = arith.addf %261, %262 : vector<8x32xf32>
    %264 = math.tanh %263 : vector<8x32xf32>
    %265 = arith.mulf %260, %264 : vector<8x32xf32>
    %266 = vector.broadcast %3 : vector<1x32xf32> to vector<8x32xf32>
    %267 = arith.mulf %265, %266 : vector<8x32xf32>
    %cst_70 = arith.constant dense<0.000000e+00> : vector<8xf32>
    %268 = vector.multi_reduction <add>, %267, %cst_70 [1] : vector<8x32xf32> to vector<8xf32>
    %269 = vector.shape_cast %268 : vector<8xf32> to vector<8x1xf32>
    %270 = vector.broadcast %4 : vector<1x1xf32> to vector<8x1xf32>
    %271 = arith.addf %269, %270 : vector<8x1xf32>
    %272 = vector.broadcast %c6_i32 : i32 to vector<8x8xi32>
    %273 = arith.cmpi eq, %46, %272 : vector<8x8xi32>
    %274 = vector.shape_cast %271 : vector<8x1xf32> to vector<8x1xf32>
    %275 = vector.broadcast %274 : vector<8x1xf32> to vector<8x8xf32>
    %276 = arith.select %273, %275, %239 : vector<8x8xi1>, vector<8x8xf32>
    %c7_i32 = arith.constant 7 : i32
    %277 = arith.index_cast %c7_i32 : i32 to index
    %c0_71 = arith.constant 0 : index
    %c0_72 = arith.constant 0 : index
    %278 = vector.load %arg6[%277, %c0_71, %c0_72] : memref<8x8x128xf32, #tpu.memory_space<vmem>>, vector<1x8x128xf32>
    %279 = vector.shape_cast %278 : vector<1x8x128xf32> to vector<8x128xf32>
    %280 = arith.index_cast %c7_i32 : i32 to index
    %c0_73 = arith.constant 0 : index
    %c0_74 = arith.constant 0 : index
    %281 = vector.load %arg7[%280, %c0_73, %c0_74] : memref<8x8x128xf32, #tpu.memory_space<vmem>>, vector<1x8x128xf32>
    %282 = vector.shape_cast %281 : vector<1x8x128xf32> to vector<8x128xf32>
    %283 = vector.broadcast %234 : vector<8x1xf32> to vector<8x128xf32>
    %284 = arith.mulf %283, %282 : vector<8x128xf32>
    %285 = arith.addf %279, %284 : vector<8x128xf32>
    %cst_75 = arith.constant dense<0.000000e+00> : vector<8x128xf32>
    %286 = tpu.matmul %265, %7, %cst_75 {dimension_numbers = #tpu.dot_dimension_numbers<[1], [0], [0], [1], [0, 0, 1, 1], [], []>} : vector<8x32xf32>, vector<32x128xf32>, vector<8x128xf32> -> vector<8x128xf32>
    %287 = arith.addf %285, %286 : vector<8x128xf32>
    %288 = arith.negf %287 : vector<8x128xf32>
    %289 = math.exp %288 : vector<8x128xf32>
    %cst_76 = arith.constant 1.000000e+00 : f32
    %290 = vector.broadcast %cst_76 : f32 to vector<8x128xf32>
    %291 = arith.addf %290, %289 : vector<8x128xf32>
    %292 = arith.divf %290, %291 : vector<8x128xf32>
    %293 = math.tanh %287 : vector<8x128xf32>
    %294 = vector.extract_strided_slice %292 {offsets = [0, 0], sizes = [8, 32], strides = [1, 1]} : vector<8x128xf32> to vector<8x32xf32>
    %295 = vector.extract_strided_slice %292 {offsets = [0, 32], sizes = [8, 32], strides = [1, 1]} : vector<8x128xf32> to vector<8x32xf32>
    %296 = vector.extract_strided_slice %293 {offsets = [0, 64], sizes = [8, 32], strides = [1, 1]} : vector<8x128xf32> to vector<8x32xf32>
    %297 = vector.extract_strided_slice %292 {offsets = [0, 96], sizes = [8, 32], strides = [1, 1]} : vector<8x128xf32> to vector<8x32xf32>
    %298 = arith.mulf %295, %263 : vector<8x32xf32>
    %299 = arith.mulf %294, %296 : vector<8x32xf32>
    %300 = arith.addf %298, %299 : vector<8x32xf32>
    %301 = math.tanh %300 : vector<8x32xf32>
    %302 = arith.mulf %297, %301 : vector<8x32xf32>
    %303 = vector.broadcast %3 : vector<1x32xf32> to vector<8x32xf32>
    %304 = arith.mulf %302, %303 : vector<8x32xf32>
    %cst_77 = arith.constant dense<0.000000e+00> : vector<8xf32>
    %305 = vector.multi_reduction <add>, %304, %cst_77 [1] : vector<8x32xf32> to vector<8xf32>
    %306 = vector.shape_cast %305 : vector<8xf32> to vector<8x1xf32>
    %307 = vector.broadcast %4 : vector<1x1xf32> to vector<8x1xf32>
    %308 = arith.addf %306, %307 : vector<8x1xf32>
    %309 = vector.broadcast %c7_i32 : i32 to vector<8x8xi32>
    %310 = arith.cmpi eq, %46, %309 : vector<8x8xi32>
    %311 = vector.shape_cast %308 : vector<8x1xf32> to vector<8x1xf32>
    %312 = vector.broadcast %311 : vector<8x1xf32> to vector<8x8xf32>
    %313 = arith.select %310, %312, %276 : vector<8x8xi1>, vector<8x8xf32>
    %c7_i32_78 = arith.constant 7 : i32
    %cst_79 = arith.constant 1.000000e+00 : f32
    %314 = vector.broadcast %cst_79 : f32 to vector<8x1xf32>
    %315 = vector.extract_strided_slice %313 {offsets = [0, 0], sizes = [8, 7], strides = [1, 1]} : vector<8x8xf32> to vector<8x7xf32>
    %316 = tpu.concatenate %314, %315 in 1 : vector<8x1xf32>, vector<8x7xf32> -> vector<8x8xf32>
    %317 = arith.mulf %316, %18 : vector<8x8xf32>
    %c0_80 = arith.constant 0 : index
    %c0_81 = arith.constant 0 : index
    %318 = vector.load %arg4[%c0_80, %c0_81] : memref<8x8xf32, #tpu.memory_space<vmem>>, vector<8x8xf32>
    tpu.vector_store %arg4[%c0_80, %c0_81], %317 {strides = array<i32>} : memref<8x8xf32, #tpu.memory_space<vmem>>, vector<8x8xf32>,
    %c0_82 = arith.constant 0 : index
    %c0_83 = arith.constant 0 : index
    %319 = vector.load %arg5[%c0_82, %c0_83] : memref<8x8xf32, #tpu.memory_space<vmem>>, vector<8x8xf32>
    tpu.vector_store %arg5[%c0_82, %c0_83], %313 {strides = array<i32>} : memref<8x8xf32, #tpu.memory_space<vmem>>, vector<8x8xf32>,
    return
  }
}

</mosaic_0001>

<bundles_post_ra>
// kernel: tpu_custom_call.1
= control target key start
LH: loop header
LB: loop body
LE: loop exit
PB: predicated region body
PF: predicated region fallthrough
CT: control target
= control target key end

     0   :  { %11 = vsyncpa [#allocation5], 0  ;;  %v130_v1 = vlaneseq  ;;  %s1469_s20 = smov 1   ;;  %v1470_v2 = vmov 0.0   ;;  %vm1471_vm0 = vmmov 0   ;;  %s1840_s0 = inlined_call_operand.vmem [shape: f32[8,8,1], index: 0, kind: input, shape index: {}]   ;;  %s1841_s1 = inlined_call_operand.vmem [shape: f32[8,8], index: 1, kind: input, shape index: {}]   ;;  %s1842_s2 = inlined_call_operand.vmem [shape: f32[8,128], index: 2, kind: input, shape index: {}]   ;;  %s1843_s3 = inlined_call_operand.vmem [shape: f32[32,128], index: 3, kind: input, shape index: {}]   ;;  %s1844_s4 = inlined_call_operand.hbm [shape: f32[8,8], index: 4, kind: output, shape index: {0}]   ;;  %s1845_s5 = inlined_call_operand.hbm [shape: f32[8,8], index: 5, kind: output, shape index: {1}]  }
   0x1   :  { %v50_v0 = vld [vmem:[%s1840_s0] sm:$0xff]  ;;  %1231 = vmatprep.subr.mxu0 %v1470_v2  ;;  %v1519_v3 = vld [vmem:[%s1843_s3 + $0x18] sm:$0xff]  ;;  %v1524_v4 = vld [vmem:[%s1843_s3 + $0x10] sm:$0xff]  ;;  %1239 = vmatprep.mubr.msk.f32.mxu0 %vm1471_vm0, %v1470_v2 }
   0x2   :  { %134 = vrot.lane.b32.xlu0 %v50_v0, %s1469_s20  ;;  %v131_v5 = vshrl.u32 %v130_v1, 7  ;;  %1232 = vmatpush3.msra.mxu0 %v1519_v3  ;;  %v1533_v6 = vld [vmem:[%s1840_s0 + $0x8] sm:$0xff] }
   0x3   :  { %12 = vsyncpa [#allocation7], 0  ;;  %v1538_v7 = vld [vmem:[%s1842_s2 + $0x4] sm:$0x1]  ;;  %1233 = vmatprep.subr.mxu0 %v1470_v2  ;;  %v1544_v8 = vld [vmem:[%s1843_s3 + $0x8] sm:$0xff]  ;;  %v1472_v9 = vmov 0   ;;  %1242 = vmatprep.subr.mxu1 %v1470_v2 }
   0x4   :  { %1324 = vset.pattern.permute.xlu1 %v1472_v9  ;;  %v132_v10 = vsub.s32 0, %v131_v5  ;;  %1234 = vmatpush3.msra.mxu0 %v1524_v4  ;;  %v1553_v11 = vld [vmem:[%s1843_s3] sm:$0xff]  ;;  %v1473_v12 = vmov 1   ;;  %s1474_s8 = smov 127   ;;  %s1475_s14 = smov 64   ;;  %v1620_v50 = vld [vmem:[%s1840_s0 + $0x10] sm:$0xff] }
   0x5   :  { %65 = vperm.xlu1 %1324, %v1533_v6   ;;  %1235 = vmatprep.subr.mxu0 %v1470_v2  ;;  %v1596_v27 = vld [vmem:[%s1842_s2] ss:$0 sm:$0xff]  ;;  %v1602_v29 = vld [vmem:[%s1842_s2 + $0x2] ss:$0 sm:$0xff]  ;;  %v1607_v30 = vld [vmem:[%s1842_s2 + $0x1] ss:$0 sm:$0xff] }
   0x6   :  { %1327 = vset.pattern.permute.xlu0 %v1473_v12  ;;  %v1557_v13 = vrot.slane %v1538_v7, %v132_v10  ;;  %1236 = vmatpush3.msra.mxu0 %v1544_v8  ;;  %s1476_s15 = smov 32   ;;  %vm278_vm1 = vcmask 261120   ;;  %s1477_s21 = smov 96   ;;  %vm1139_vm10 = vcmask 64512  }
   0x7   :  { %1237 = vmatprep.subr.mxu0 %v1470_v2  ;;  %1243 = vmatpush3.msra.mxu1 %v1519_v3  ;;  %s1479_s6 = smov [#allocation6]  }
   0x8   :  { %163 = vrot.lane.b32.xlu0 %v1557_v13, %s1474_s8  ;;  %1238 = vmatpush3.msra.mxu0 %v1553_v11  ;;  %s1158_s7 = sshll.u32 %s1479_s6, 4  ;;  %s1159_s7 = int_to_ptr.vmem [resolvable:$true] %s1158_s7 }
   0x9   :  { %1240 = vmatmul.mubr.f32.vlgmr.msra.gmra.mxu0 %v1470_v2  ;;  %1325 = vset.pattern.permute.xlu1 %v1473_v12  ;;  %p1430_p1 = scmp.lt.s32.totalorder %s1159_s7, %s1159_s7 }
   0xa   :  { %1244 = vmatprep.subr.mxu1 %v1470_v2  ;;  %1250 = vmatprep.mubr.msk.f32.mxu1 %vm1471_vm0, %v1470_v2 }
   0xb   :  { %1245 = vmatpush3.msra.mxu1 %v1524_v4  ;;  %1253 = vmatprep.subr.mxu0 %v1470_v2 }
   0xc   :  { %1246 = vmatprep.subr.mxu1 %v1470_v2  ;;  %1254 = vmatpush3.msra.mxu0 %v1519_v3 }
   0xd   :  { %1247 = vmatpush3.msra.mxu1 %v1544_v8  ;;  %1255 = vmatprep.subr.mxu0 %v1470_v2 }
   0xe   :  { %1248 = vmatprep.subr.mxu1 %v1470_v2  ;;  %1256 = vmatpush3.msra.mxu0 %v1524_v4 }
   0xf   :  { %1249 = vmatpush3.msra.mxu1 %v1553_v11  ;;  %1257 = vmatprep.subr.mxu0 %v1470_v2 }
  0x10   :  { %1258 = vmatpush3.msra.mxu0 %v1544_v8  ;;  %1261 = vmatprep.mubr.msk.f32.mxu0 %vm1471_vm0, %v1470_v2 }
  0x11   :  { %1259 = vmatprep.subr.mxu0 %v1470_v2  ;;  %1264 = vmatprep.subr.mxu1 %v1470_v2 }
  0x12   :  { %1260 = vmatpush3.msra.mxu0 %v1553_v11 }
  0x13   :  { %1275 = vmatprep.subr.mxu0 %v1470_v2 }
  0x74   :  { %v135_v14 = vpop.permute.xlu0 %134 }
  0x75   :  { %v155_v15 = vmul.f32 %v135_v14, %v1557_v13 }
  0x7a   :  { %v1589_v16 = vpop.permute.xlu0 %163 }
  0x7b   :  { %v166_v17 = vadd.f32 %v1589_v16, %v155_v15 }
  0x7d   :  { %v1173_v18 = vadd.f32 -1.0, %v166_v17 }
  0x7f   :  { %v180_v19 = vmul.f32 1.442695, %v1173_v18 }
  0x80   :  { %v66_v26 = vpop.permute.xlu1 %65 }
  0x81   :  { %1337 = vpow2.f32 %v180_v19  ;;  %v103_v28 = vmul.f32 %v1596_v27, %v66_v26 }
  0x83   :  { %v115_v32 = vadd.f32 %v1602_v29, %v103_v28 }
  0x8e   :  { %v1338_v20 = vpop.eup %1337 }
  0x8f   :  { %v194_v21 = vadd.f32 1.0, %v1338_v20 }
  0x91   :  { %1339 = vlog2.f32 %v194_v21 }
  0x9e   :  { %v1340_v22 = vpop.eup %1339 }
  0x9f   :  { %v202_v23 = vmul.f32 0.6931472, %v1340_v22 }
  0xa1   :  { %217 = vperm.xlu1 %1325, %v202_v23   ;;  %v1183_v23 = vld [vmem:[%s1842_s2 + $0x3] ss:$0 sm:$0xff] }
  0xa5   :  { %1326 = vset.pattern.permute.xlu1 %v1472_v9 }
  0xc9   :  { %v348_v24 = vpop.f32.mrf.mxu0 }
  0xcb   :  { %v1241_v25 = vpop.f32.mrf.mxu0 }
 0x11c   :  { %v218_v31 = vpop.permute.xlu1 %217 }
 0x11d   :  { %v254_v33 = vmul.f32 %v1607_v30, %v218_v31 }
 0x11f   :  { %v277_v34 = vadd.f32 %v254_v33, %v115_v32 }
 0x121   :  { %v352_v35 = vadd.f32 %v348_v24, %v277_v34 }
 0x123   :  { %1341 = vtanh.f32 %v352_v35  ;;  %v1182_v37 = vmul.f32 -1.442695, %v352_v35 }
 0x125   :  { %1343 = vpow2.f32 %v1182_v37 }
 0x130   :  { %v1342_v36 = vpop.eup %1341 }
 0x131   :  { %362 = vrot.lane.b32.xlu0 %v1342_v36, %s1475_s14 }
 0x132   :  { %v1344_v38 = vpop.eup %1343 }
 0x133   :  { %v356_v39 = vadd.f32 1.0, %v1344_v38 }
 0x135   :  { %1345 = vrcp.f32 %v356_v39 }
 0x142   :  { %v1346_v40 = vpop.eup %1345 }
 0x143   :  { %v360_v43 = vmul.f32 0.0, %v1346_v40 }
 0x1a3   :  { %v363_v41 = vpop.permute.xlu0 %362 }
 0x1a4   :  { %v365_v42 = vmul.f32 %v1346_v40, %v363_v41 }
 0x1a6   :  { %367 = vrot.lane.b32.xlu1 %v365_v42, %s1476_s15 }
 0x218   :  { %v368_v44 = vpop.permute.xlu1 %367 }
 0x219   :  { %v370_v45 = vadd.f32 %v368_v44, %v360_v43 }
 0x21b   :  { %1347 = vtanh.f32 %v370_v45 }
 0x228   :  { %v1348_v46 = vpop.eup %1347 }
 0x229   :  { %373 = vrot.lane.b32.xlu0 %v1348_v46, %s1475_s14 }
 0x22d   :  { %136 = vrot.lane.b32.xlu0 %v1533_v6, %s1469_s20 }
 0x29b   :  { %v374_v47 = vpop.permute.xlu0 %373 }
 0x29c   :  { %v376_v48 = vmul.f32 %v1346_v40, %v374_v47  ;;  %v53_v47 = vld [vmem:[%s1840_s0 + $0x18] sm:$0xff] }
 0x29e   :  { %407 = vrot.lane.b32.xlu1 %v376_v48, %s1476_s15 }
 0x29f   :  { %v137_v49 = vpop.permute.xlu0 %136 }
 0x2a0   :  { %v156_v51 = vmul.f32 %v137_v49, %v1557_v13 }
 0x2a2   :  { %v167_v52 = vadd.f32 %v1589_v16, %v156_v51  ;;  %70 = vperm.xlu1 %1326, %v1620_v50  }
 0x2a4   :  { %v1174_v53 = vadd.f32 -1.0, %v167_v52 }
 0x2a6   :  { %v182_v54 = vmul.f32 1.442695, %v1174_v53 }
 0x2a8   :  { %1349 = vpow2.f32 %v182_v54 }
 0x2b5   :  { %v1350_v55 = vpop.eup %1349 }
 0x2b6   :  { %v195_v56 = vadd.f32 1.0, %v1350_v55 }
 0x2b8   :  { %1351 = vlog2.f32 %v195_v56 }
 0x2c5   :  { %v1352_v57 = vpop.eup %1351 }
 0x2c6   :  { %v204_v58 = vmul.f32 0.6931472, %v1352_v57 }
 0x2c8   :  { %222 = vperm.xlu0 %1327, %v204_v58  }
 0x310   :  { %v408_v59 = vpop.permute.xlu1 %407 }
 0x311   :  { %1251 = vmatmul.mubr.msk.f32.vlgmr.msra.gmra.mxu1 %vm278_vm1, %v408_v59 }
 0x312   :  { %1265 = vmatpush3.msra.mxu1 %v1519_v3  ;;  %1272 = vmatprep.mubr.msk.f32.mxu1 %vm1471_vm0, %v1470_v2 }
 0x313   :  { %1266 = vmatprep.subr.mxu1 %v1470_v2 }
 0x314   :  { %1267 = vmatpush3.msra.mxu1 %v1524_v4 }
 0x315   :  { %1268 = vmatprep.subr.mxu1 %v1470_v2 }
 0x316   :  { %1269 = vmatpush3.msra.mxu1 %v1544_v8 }
 0x317   :  { %1270 = vmatprep.subr.mxu1 %v1470_v2 }
 0x318   :  { %1271 = vmatpush3.msra.mxu1 %v1553_v11 }
 0x319   :  { %1286 = vmatprep.subr.mxu1 %v1470_v2 }
 0x31d   :  { %v71_v60 = vpop.permute.xlu1 %70 }
 0x31e   :  { %v104_v61 = vmul.f32 %v1596_v27, %v71_v60 }
 0x320   :  { %v116_v63 = vadd.f32 %v1602_v29, %v104_v61 }
 0x343   :  { %v223_v62 = vpop.permute.xlu0 %222 }
 0x344   :  { %v255_v0 = vmul.f32 %v1607_v30, %v223_v62 }
 0x346   :  { %v405_v5 = vadd.f32 %v255_v0, %v116_v63 }
 0x3d1   :  { %v477_v6 = vpop.f32.mrf.mxu1 }
 0x3d2   :  { %v481_v10 = vadd.f32 %v477_v6, %v405_v5 }
 0x3d3   :  { %v1252_v14 = vpop.f32.mrf.mxu1 }
 0x3d4   :  { %1353 = vtanh.f32 %v481_v10  ;;  %v1185_v17 = vmul.f32 -1.442695, %v481_v10 }
 0x3d6   :  { %1355 = vpow2.f32 %v1185_v17 }
 0x3e1   :  { %v1354_v15 = vpop.eup %1353 }
 0x3e2   :  { %491 = vrot.lane.b32.xlu1 %v1354_v15, %s1475_s14 }
 0x3e3   :  { %v1356_v18 = vpop.eup %1355 }
 0x3e4   :  { %v485_v19 = vadd.f32 1.0, %v1356_v18 }
 0x3e6   :  { %1357 = vrcp.f32 %v485_v19 }
 0x3f3   :  { %v1358_v20 = vpop.eup %1357 }
 0x3f4   :  { %v489_v24 = vmul.f32 %v1358_v20, %v370_v45 }
 0x454   :  { %v492_v21 = vpop.permute.xlu1 %491 }
 0x455   :  { %v494_v22 = vmul.f32 %v1358_v20, %v492_v21 }
 0x457   :  { %496 = vrot.lane.b32.xlu1 %v494_v22, %s1476_s15 }
 0x45b   :  { %382 = vrot.lane.b32.xlu1 %v1183_v23, %s1477_s21  ;;  %v1695_v23 = vld [vmem:[%s1840_s0 + $0x20] sm:$0xff] }
 0x4c9   :  { %v497_v25 = vpop.permute.xlu1 %496 }
 0x4ca   :  { %v1644_v26 = vadd.f32 %v497_v25, %v489_v24 }
 0x4cc   :  { %1359 = vtanh.f32 %v1644_v26 }
 0x4cd   :  { %v1647_v28 = vpop.permute.xlu1 %382 }
 0x4ce   :  { %v385_v31 = vmul.f32 %v1647_v28, %v376_v48 }
 0x4d0   :  { %387 = vrot.lane.b32.xlu1 %v385_v31, %s1476_s15 }
 0x4d9   :  { %v1360_v32 = vpop.eup %1359 }
 0x4da   :  { %502 = vrot.lane.b32.xlu0 %v1360_v32, %s1475_s14 }
 0x542   :  { %v388_v33 = vpop.permute.xlu1 %387 }
 0x543   :  { %v390_v34 = vsel %vm278_vm1, %v388_v33, 0.0 }
 0x544   :  { %391 = vadd.xlane.f32.xlu1 %v390_v34 }
 0x54c   :  { %v503_v35 = vpop.permute.xlu0 %502 }
 0x54d   :  { %v505_v36 = vmul.f32 %v1358_v20, %v503_v35 }
 0x54f   :  { %529 = vrot.lane.b32.xlu0 %v505_v36, %s1476_s15  ;;  %v506_v19 = vmul.f32 %v505_v36, %v1647_v28 }
 0x553   :  { %138 = vrot.lane.b32.xlu0 %v1620_v50, %s1469_s20 }
 0x5c1   :  { %v530_v37 = vpop.permute.xlu0 %529 }
 0x5c2   :  { %1262 = vmatmul.mubr.msk.f32.vlgmr.msra.gmra.mxu0 %vm278_vm1, %v530_v37 }
 0x5c3   :  { %1276 = vmatpush3.msra.mxu0 %v1519_v3  ;;  %1283 = vmatprep.mubr.msk.f32.mxu0 %vm1471_vm0, %v1470_v2 }
 0x5c4   :  { %1277 = vmatprep.subr.mxu0 %v1470_v2 }
 0x5c5   :  { %v139_v38 = vpop.permute.xlu0 %138  ;;  %1278 = vmatpush3.msra.mxu0 %v1524_v4 }
 0x5c6   :  { %v157_v39 = vmul.f32 %v139_v38, %v1557_v13  ;;  %1279 = vmatprep.subr.mxu0 %v1470_v2 }
 0x5c7   :  { %1280 = vmatpush3.msra.mxu0 %v1544_v8 }
 0x5c8   :  { %v168_v40 = vadd.f32 %v1589_v16, %v157_v39  ;;  %1281 = vmatprep.subr.mxu0 %v1470_v2 }
 0x5c9   :  { %1282 = vmatpush3.msra.mxu0 %v1553_v11 }
 0x5ca   :  { %v1175_v41 = vadd.f32 -1.0, %v168_v40  ;;  %1297 = vmatprep.subr.mxu0 %v1470_v2 }
 0x5cc   :  { %v184_v42 = vmul.f32 1.442695, %v1175_v41 }
 0x5cd   :  { %v392_v48 = vpop.xlane.xlu1 %391 }
 0x5ce   :  { %1361 = vpow2.f32 %v184_v42  ;;  %v393_v49 = vadd.f32 %v392_v48, %v1557_v13 }
 0x5db   :  { %v1362_v43 = vpop.eup %1361 }
 0x5dc   :  { %v196_v44 = vadd.f32 1.0, %v1362_v43 }
 0x5de   :  { %1363 = vlog2.f32 %v196_v44 }
 0x5eb   :  { %v1364_v45 = vpop.eup %1363 }
 0x5ec   :  { %v206_v46 = vmul.f32 0.6931472, %v1364_v45 }
 0x5ee   :  { %227 = vperm.xlu0 %1327, %v206_v46  }
 0x5f2   :  { %1328 = vset.pattern.permute.xlu0 %v1472_v9 }
 0x5f3   :  { %75 = vperm.xlu0 %1328, %v53_v47  }
 0x5f7   :  { %397 = vperm.xlu0 %1328, %v393_v49  }
 0x5fb   :  { %1331 = vset.pattern.permute.xlu0 %v1473_v12 }
 0x669   :  { %v228_v50 = vpop.permute.xlu0 %227 }
 0x66a   :  { %v256_v54 = vmul.f32 %v1607_v30, %v228_v50 }
 0x66e   :  { %v76_v51 = vpop.permute.xlu0 %75 }
 0x66f   :  { %v105_v52 = vmul.f32 %v1596_v27, %v76_v51 }
 0x671   :  { %v117_v55 = vadd.f32 %v1602_v29, %v105_v52 }
 0x672   :  { %v1676_v53 = vpop.permute.xlu0 %397 }
 0x673   :  { %v526_v56 = vmul.f32 %v1676_v53, %v256_v54 }
 0x675   :  { %v527_v57 = vadd.f32 %v526_v56, %v117_v55 }
 0x682   :  { %v599_v58 = vpop.f32.mrf.mxu0 }
 0x683   :  { %v603_v59 = vadd.f32 %v599_v58, %v527_v57 }
 0x684   :  { %v1263_v60 = vpop.f32.mrf.mxu0 }
 0x685   :  { %1365 = vtanh.f32 %v603_v59  ;;  %v1187_v62 = vmul.f32 -1.442695, %v603_v59 }
 0x687   :  { %1367 = vpow2.f32 %v1187_v62 }
 0x692   :  { %v1366_v61 = vpop.eup %1365 }
 0x693   :  { %613 = vrot.lane.b32.xlu0 %v1366_v61, %s1475_s14 }
 0x694   :  { %v1368_v63 = vpop.eup %1367 }
 0x695   :  { %v607_v0 = vadd.f32 1.0, %v1368_v63 }
 0x697   :  { %1369 = vrcp.f32 %v607_v0 }
 0x6a4   :  { %v1370_v5 = vpop.eup %1369 }
 0x6a5   :  { %v611_v14 = vmul.f32 %v1370_v5, %v1644_v26 }
 0x705   :  { %v614_v6 = vpop.permute.xlu0 %613 }
 0x706   :  { %v616_v10 = vmul.f32 %v1370_v5, %v614_v6 }
 0x708   :  { %618 = vrot.lane.b32.xlu0 %v616_v10, %s1476_s15 }
 0x77a   :  { %v619_v15 = vpop.permute.xlu0 %618 }
 0x77b   :  { %v1684_v17 = vadd.f32 %v619_v15, %v611_v14 }
 0x77d   :  { %1371 = vtanh.f32 %v1684_v17 }
 0x78a   :  { %v1372_v18 = vpop.eup %1371 }
 0x78b   :  { %624 = vrot.lane.b32.xlu0 %v1372_v18, %s1475_s14 }
 0x78f   :  { %508 = vrot.lane.b32.xlu0 %v506_v19, %s1476_s15 }
 0x793   :  { %140 = vrot.lane.b32.xlu0 %v53_v47, %s1469_s20 }
 0x7fd   :  { %v625_v20 = vpop.permute.xlu0 %624 }
 0x7fe   :  { %v627_v21 = vmul.f32 %v1370_v5, %v625_v20 }
 0x800   :  { %651 = vrot.lane.b32.xlu1 %v627_v21, %s1476_s15  ;;  %v628_v34 = vmul.f32 %v627_v21, %v1647_v28 }
 0x801   :  { %v509_v22 = vpop.permute.xlu0 %508 }
 0x802   :  { %v511_v24 = vsel %vm278_vm1, %v509_v22, 0.0 }
 0x803   :  { %512 = vadd.xlane.f32.xlu0 %v511_v24  ;;  %v55_v24 = vld [vmem:[%s1840_s0 + $0x28] sm:$0xff] }
 0x804   :  { %80 = vperm.xlu1 %1326, %v1695_v23  }
 0x805   :  { %v141_v25 = vpop.permute.xlu0 %140 }
 0x806   :  { %v158_v26 = vmul.f32 %v141_v25, %v1557_v13 }
 0x808   :  { %v169_v31 = vadd.f32 %v1589_v16, %v158_v26  ;;  %1329 = vset.pattern.permute.xlu1 %v1473_v12 }
 0x80a   :  { %v1176_v32 = vadd.f32 -1.0, %v169_v31 }
 0x80c   :  { %v186_v33 = vmul.f32 1.442695, %v1176_v32 }
 0x80e   :  { %1373 = vpow2.f32 %v186_v33 }
 0x819   :  { %630 = vrot.lane.b32.xlu0 %v628_v34, %s1476_s15 }
 0x81b   :  { %v1374_v35 = vpop.eup %1373 }
 0x81c   :  { %v197_v36 = vadd.f32 1.0, %v1374_v35 }
 0x81e   :  { %1375 = vlog2.f32 %v197_v36 }
 0x82b   :  { %v1376_v37 = vpop.eup %1375 }
 0x82c   :  { %v208_v38 = vmul.f32 0.6931472, %v1376_v37 }
 0x82e   :  { %232 = vperm.xlu1 %1329, %v208_v38  }
 0x832   :  { %1330 = vset.pattern.permute.xlu1 %v1472_v9 }
 0x872   :  { %v652_v39 = vpop.permute.xlu1 %651 }
 0x873   :  { %1273 = vmatmul.mubr.msk.f32.vlgmr.msra.gmra.mxu1 %vm278_vm1, %v652_v39 }
 0x874   :  { %1287 = vmatpush3.msra.mxu1 %v1519_v3  ;;  %1294 = vmatprep.mubr.msk.f32.mxu1 %vm1471_vm0, %v1470_v2 }
 0x875   :  { %1288 = vmatprep.subr.mxu1 %v1470_v2 }
 0x876   :  { %1289 = vmatpush3.msra.mxu1 %v1524_v4 }
 0x877   :  { %1290 = vmatprep.subr.mxu1 %v1470_v2 }
 0x878   :  { %1291 = vmatpush3.msra.mxu1 %v1544_v8 }
 0x879   :  { %1292 = vmatprep.subr.mxu1 %v1470_v2 }
 0x87a   :  { %1293 = vmatpush3.msra.mxu1 %v1553_v11 }
 0x87f   :  { %v81_v42 = vpop.permute.xlu1 %80 }
 0x880   :  { %v106_v45 = vmul.f32 %v1596_v27, %v81_v42 }
 0x882   :  { %v118_v48 = vadd.f32 %v1602_v29, %v106_v45 }
 0x88c   :  { %v513_v40 = vpop.xlane.xlu0 %512 }
 0x88d   :  { %v514_v41 = vadd.f32 %v513_v40, %v1557_v13 }
 0x88f   :  { %518 = vperm.xlu1 %1330, %v514_v41  }
 0x890   :  { %v631_v10 = vpop.permute.xlu0 %630 }
 0x891   :  { %v633_v14 = vsel %vm278_vm1, %v631_v10, 0.0 }
 0x8a9   :  { %v233_v43 = vpop.permute.xlu1 %232 }
 0x8aa   :  { %v257_v46 = vmul.f32 %v1607_v30, %v233_v43 }
 0x90a   :  { %v1716_v44 = vpop.permute.xlu1 %518 }
 0x90b   :  { %v648_v47 = vmul.f32 %v1716_v44, %v257_v46 }
 0x90d   :  { %v649_v49 = vadd.f32 %v648_v47, %v118_v48 }
 0x933   :  { %v721_v50 = vpop.f32.mrf.mxu1 }
 0x934   :  { %v725_v51 = vadd.f32 %v721_v50, %v649_v49 }
 0x935   :  { %v1274_v52 = vpop.f32.mrf.mxu1 }
 0x936   :  { %1377 = vtanh.f32 %v725_v51  ;;  %v1189_v55 = vmul.f32 -1.442695, %v725_v51 }
 0x938   :  { %1379 = vpow2.f32 %v1189_v55 }
 0x943   :  { %v1378_v54 = vpop.eup %1377 }
 0x944   :  { %735 = vrot.lane.b32.xlu1 %v1378_v54, %s1475_s14 }
 0x945   :  { %v1380_v56 = vpop.eup %1379 }
 0x946   :  { %v729_v57 = vadd.f32 1.0, %v1380_v56 }
 0x948   :  { %1381 = vrcp.f32 %v729_v57 }
 0x955   :  { %v1382_v58 = vpop.eup %1381 }
 0x956   :  { %v733_v61 = vmul.f32 %v1382_v58, %v1684_v17 }
 0x9b6   :  { %v736_v59 = vpop.permute.xlu1 %735 }
 0x9b7   :  { %v738_v60 = vmul.f32 %v1382_v58, %v736_v59 }
 0x9b9   :  { %740 = vrot.lane.b32.xlu1 %v738_v60, %s1476_s15 }
 0xa2b   :  { %v741_v62 = vpop.permute.xlu1 %740 }
 0xa2c   :  { %v1725_v63 = vadd.f32 %v741_v62, %v733_v61 }
 0xa2e   :  { %1383 = vtanh.f32 %v1725_v63 }
 0xa3b   :  { %v1384_v0 = vpop.eup %1383 }
 0xa3c   :  { %746 = vrot.lane.b32.xlu1 %v1384_v0, %s1475_s14 }
 0xaae   :  { %v747_v5 = vpop.permute.xlu1 %746 }
 0xaaf   :  { %v1729_v6 = vmul.f32 %v1382_v58, %v747_v5  ;;  %v57_v5 = vld [vmem:[%s1840_s0 + $0x38] sm:$0xff] }
 0xab1   :  { %773 = vrot.lane.b32.xlu1 %v1729_v6, %s1476_s15  ;;  %v750_v55 = vmul.f32 %v1729_v6, %v1647_v28 }
 0xab5   :  { %142 = vrot.lane.b32.xlu1 %v1695_v23, %s1469_s20 }
 0xad9   :  { %634 = vadd.xlane.f32.xlu1 %v633_v14 }
 0xb23   :  { %v774_v15 = vpop.permute.xlu1 %773 }
 0xb24   :  { %1284 = vmatmul.mubr.msk.f32.vlgmr.msra.gmra.mxu0 %vm278_vm1, %v774_v15 }
 0xb25   :  { %1298 = vmatpush3.msra.mxu0 %v1519_v3  ;;  %1305 = vmatprep.mubr.msk.f32.mxu0 %vm1471_vm0, %v1470_v2 }
 0xb26   :  { %1299 = vmatprep.subr.mxu0 %v1470_v2 }
 0xb27   :  { %v143_v17 = vpop.permute.xlu1 %142  ;;  %1300 = vmatpush3.msra.mxu0 %v1524_v4 }
 0xb28   :  { %v159_v18 = vmul.f32 %v143_v17, %v1557_v13  ;;  %1301 = vmatprep.subr.mxu0 %v1470_v2  ;;  %v56_v17 = vld [vmem:[%s1840_s0 + $0x30] sm:$0xff]  ;;  %s1478_s0 = smov 126  }
 0xb29   :  { %1302 = vmatpush3.msra.mxu0 %v1544_v8 }
 0xb2a   :  { %v170_v19 = vadd.f32 %v1589_v16, %v159_v18  ;;  %1303 = vmatprep.subr.mxu0 %v1470_v2 }
 0xb2b   :  { %1304 = vmatpush3.msra.mxu0 %v1553_v11 }
 0xb2c   :  { %v1177_v3 = vadd.f32 -1.0, %v170_v19 }
 0xb2e   :  { %v188_v20 = vmul.f32 1.442695, %v1177_v3 }
 0xb30   :  { %1385 = vpow2.f32 %v188_v20 }
 0xb3d   :  { %v1386_v21 = vpop.eup %1385 }
 0xb3e   :  { %v198_v22 = vadd.f32 1.0, %v1386_v21 }
 0xb40   :  { %1387 = vlog2.f32 %v198_v22 }
 0xb4d   :  { %v1388_v23 = vpop.eup %1387 }
 0xb4e   :  { %v210_v4 = vmul.f32 0.6931472, %v1388_v23 }
 0xb50   :  { %237 = vperm.xlu0 %1331, %v210_v4  }
 0xb54   :  { %1332 = vset.pattern.permute.xlu0 %v1472_v9 }
 0xb55   :  { %85 = vperm.xlu0 %1332, %v55_v24  }
 0xb62   :  { %v635_v8 = vpop.xlane.xlu1 %634 }
 0xb63   :  { %v636_v25 = vadd.f32 %v635_v8, %v1557_v13 }
 0xb65   :  { %640 = vperm.xlu0 %1332, %v636_v25  }
 0xb69   :  { %1333 = vset.pattern.permute.xlu0 %v1473_v12 }
 0xbcb   :  { %v238_v11 = vpop.permute.xlu0 %237 }
 0xbcc   :  { %v258_v32 = vmul.f32 %v1607_v30, %v238_v11 }
 0xbd0   :  { %v86_v26 = vpop.permute.xlu0 %85 }
 0xbd1   :  { %v107_v31 = vmul.f32 %v1596_v27, %v86_v26 }
 0xbd3   :  { %v119_v34 = vadd.f32 %v1602_v29, %v107_v31 }
 0xbe0   :  { %v1756_v33 = vpop.permute.xlu0 %640 }
 0xbe1   :  { %v770_v35 = vmul.f32 %v1756_v33, %v258_v32 }
 0xbe3   :  { %v771_v36 = vadd.f32 %v770_v35, %v119_v34 }
 0xbe4   :  { %v843_v37 = vpop.f32.mrf.mxu0 }
 0xbe5   :  { %v847_v38 = vadd.f32 %v843_v37, %v771_v36 }
 0xbe6   :  { %v1285_v39 = vpop.f32.mrf.mxu0 }
 0xbe7   :  { %1389 = vtanh.f32 %v847_v38  ;;  %v1191_v41 = vmul.f32 -1.442695, %v847_v38 }
 0xbe9   :  { %1391 = vpow2.f32 %v1191_v41 }
 0xbf4   :  { %v1390_v40 = vpop.eup %1389 }
 0xbf5   :  { %857 = vrot.lane.b32.xlu0 %v1390_v40, %s1475_s14 }
 0xbf6   :  { %v1392_v42 = vpop.eup %1391 }
 0xbf7   :  { %v851_v43 = vadd.f32 1.0, %v1392_v42 }
 0xbf9   :  { %1393 = vrcp.f32 %v851_v43 }
 0xc06   :  { %v1394_v45 = vpop.eup %1393 }
 0xc07   :  { %v855_v48 = vmul.f32 %v1394_v45, %v1725_v63 }
 0xc67   :  { %v858_v46 = vpop.permute.xlu0 %857 }
 0xc68   :  { %v860_v47 = vmul.f32 %v1394_v45, %v858_v46 }
 0xc6a   :  { %862 = vrot.lane.b32.xlu1 %v860_v47, %s1476_s15 }
 0xcdc   :  { %v863_v49 = vpop.permute.xlu1 %862 }
 0xcdd   :  { %v865_v50 = vadd.f32 %v863_v49, %v855_v48 }
 0xcdf   :  { %1395 = vtanh.f32 %v865_v50 }
 0xcec   :  { %v1396_v51 = vpop.eup %1395 }
 0xced   :  { %868 = vrot.lane.b32.xlu0 %v1396_v51, %s1475_s14 }
 0xd5f   :  { %v869_v52 = vpop.permute.xlu0 %868 }
 0xd60   :  { %v871_v54 = vmul.f32 %v1394_v45, %v869_v52 }
 0xd62   :  { %895 = vrot.lane.b32.xlu0 %v871_v54, %s1476_s15  ;;  %v872_v0 = vmul.f32 %v871_v54, %v1647_v28 }
 0xd66   :  { %752 = vrot.lane.b32.xlu0 %v750_v55, %s1476_s15 }
 0xd6a   :  { %144 = vrot.lane.b32.xlu0 %v55_v24, %s1469_s20 }
 0xdd4   :  { %v896_v56 = vpop.permute.xlu0 %895 }
 0xdd5   :  { %1295 = vmatmul.mubr.msk.f32.vlgmr.msra.gmra.mxu1 %vm278_vm1, %v896_v56 }
 0xdd8   :  { %v753_v57 = vpop.permute.xlu0 %752 }
 0xdd9   :  { %v755_v58 = vsel %vm278_vm1, %v753_v57, 0.0 }
 0xdda   :  { %756 = vadd.xlane.f32.xlu1 %v755_v58 }
 0xddc   :  { %v145_v59 = vpop.permute.xlu0 %144 }
 0xddd   :  { %v160_v60 = vmul.f32 %v145_v59, %v1557_v13 }
 0xddf   :  { %v171_v61 = vadd.f32 %v1589_v16, %v160_v60 }
 0xde1   :  { %v1178_v62 = vadd.f32 -1.0, %v171_v61 }
 0xde3   :  { %v190_v63 = vmul.f32 1.442695, %v1178_v62 }
 0xde5   :  { %1397 = vpow2.f32 %v190_v63 }
 0xdeb   :  { %874 = vrot.lane.b32.xlu1 %v872_v0, %s1476_s15 }
 0xdef   :  { %95 = vperm.xlu1 %1330, %v57_v5  }
 0xdf2   :  { %v1398_v6 = vpop.eup %1397 }
 0xdf3   :  { %v199_v10 = vadd.f32 1.0, %v1398_v6  ;;  %1335 = vset.pattern.permute.xlu1 %v1473_v12 }
 0xdf5   :  { %1399 = vlog2.f32 %v199_v10 }
 0xe02   :  { %v1400_v14 = vpop.eup %1399 }
 0xe03   :  { %v212_v15 = vmul.f32 0.6931472, %v1400_v14 }
 0xe05   :  { %242 = vperm.xlu0 %1333, %v212_v15  }
 0xe09   :  { %1334 = vset.pattern.permute.xlu0 %v1472_v9 }
 0xe0a   :  { %90 = vperm.xlu0 %1334, %v56_v17  }
 0xe63   :  { %v757_v18 = vpop.xlane.xlu1 %756 }
 0xe64   :  { %v758_v19 = vadd.f32 %v757_v18, %v1557_v13 }
 0xe66   :  { %762 = vperm.xlu0 %1334, %v758_v19  }
 0xe67   :  { %v875_v45 = vpop.permute.xlu1 %874 }
 0xe68   :  { %v877_v46 = vsel %vm278_vm1, %v875_v45, 0.0 }
 0xe6b   :  { %v96_v61 = vpop.permute.xlu1 %95 }
 0xe80   :  { %v243_v21 = vpop.permute.xlu0 %242 }
 0xe81   :  { %v259_v23 = vmul.f32 %v1607_v30, %v243_v21 }
 0xe85   :  { %v91_v22 = vpop.permute.xlu0 %90 }
 0xe86   :  { %v108_v12 = vmul.f32 %v1596_v27, %v91_v22 }
 0xe88   :  { %v120_v24 = vadd.f32 %v1602_v29, %v108_v12 }
 0xe95   :  { %v965_v3 = vpop.f32.mrf.mxu1 }
 0xe97   :  { %v1296_v20 = vpop.f32.mrf.mxu1 }
 0xee1   :  { %v1786_v4 = vpop.permute.xlu0 %762 }
 0xee2   :  { %v892_v8 = vmul.f32 %v1786_v4, %v259_v23 }
 0xee4   :  { %v893_v25 = vadd.f32 %v892_v8, %v120_v24 }
 0xee6   :  { %v969_v11 = vadd.f32 %v965_v3, %v893_v25 }
 0xee8   :  { %1401 = vtanh.f32 %v969_v11  ;;  %v1193_v31 = vmul.f32 -1.442695, %v969_v11 }
 0xeea   :  { %1403 = vpow2.f32 %v1193_v31 }
 0xef5   :  { %v1402_v26 = vpop.eup %1401 }
 0xef6   :  { %979 = vrot.lane.b32.xlu0 %v1402_v26, %s1475_s14 }
 0xef7   :  { %v1404_v32 = vpop.eup %1403 }
 0xef8   :  { %v973_v34 = vadd.f32 1.0, %v1404_v32 }
 0xefa   :  { %1405 = vrcp.f32 %v973_v34 }
 0xf07   :  { %v1406_v35 = vpop.eup %1405 }
 0xf08   :  { %v977_v38 = vmul.f32 %v1406_v35, %v865_v50 }
 0xf68   :  { %v980_v36 = vpop.permute.xlu0 %979 }
 0xf69   :  { %v982_v37 = vmul.f32 %v1406_v35, %v980_v36 }
 0xf6b   :  { %984 = vrot.lane.b32.xlu0 %v982_v37, %s1476_s15 }
 0xfdd   :  { %v985_v39 = vpop.permute.xlu0 %984 }
 0xfde   :  { %v987_v40 = vadd.f32 %v985_v39, %v977_v38  ;;  %v270_v38 = vand.u32 127, %v130_v1 }
 0xfe0   :  { %1407 = vtanh.f32 %v987_v40  ;;  %vm271_vm2 = vcmp.eq.s32.totalorder %v270_v38, 0  ;;  %vm394_vm3 = vcmp.eq.s32.totalorder %v270_v38, 1  ;;  %vm515_vm4 = vcmp.eq.s32.totalorder %v270_v38, 2 }
 0xfe1   :  { %v1181_v39 = vsel %vm271_vm2, 1.0, %v1470_v2  ;;  %vm637_vm5 = vcmp.eq.s32.totalorder %v270_v38, 3  ;;  %vm759_vm6 = vcmp.eq.s32.totalorder %v270_v38, 4  ;;  %vm881_vm7 = vcmp.eq.s32.totalorder %v270_v38, 5 }
 0xfe2   :  { %vm1003_vm8 = vcmp.eq.s32.totalorder %v270_v38, 6  ;;  %vm1125_vm9 = vcmp.eq.s32.totalorder %v270_v38, 7 }
 0xfed   :  { %v1408_v41 = vpop.eup %1407 }
 0xfee   :  { %990 = vrot.lane.b32.xlu0 %v1408_v41, %s1475_s14 }
0x1060   :  { %v991_v42 = vpop.permute.xlu0 %990 }
0x1061   :  { %v993_v43 = vmul.f32 %v1406_v35, %v991_v42 }
0x1063   :  { %1017 = vrot.lane.b32.xlu0 %v993_v43, %s1476_s15  ;;  %v994_v47 = vmul.f32 %v993_v43, %v1647_v28 }
0x1067   :  { %146 = vrot.lane.b32.xlu0 %v56_v17, %s1469_s20 }
0x1086   :  { %878 = vadd.xlane.f32.xlu0 %v877_v46 }
0x109c   :  { %996 = vrot.lane.b32.xlu0 %v994_v47, %s1476_s15 }
0x10d5   :  { %v1018_v48 = vpop.permute.xlu0 %1017 }
0x10d6   :  { %1306 = vmatmul.mubr.msk.f32.vlgmr.msra.gmra.mxu0 %vm278_vm1, %v1018_v48 }
0x10d9   :  { %v147_v49 = vpop.permute.xlu0 %146 }
0x10da   :  { %v161_v50 = vmul.f32 %v147_v49, %v1557_v13 }
0x10dc   :  { %v172_v51 = vadd.f32 %v1589_v16, %v161_v50  ;;  %v109_v16 = vmul.f32 %v1596_v27, %v96_v61 }
0x10de   :  { %v1179_v52 = vadd.f32 -1.0, %v172_v51  ;;  %v121_v6 = vadd.f32 %v1602_v29, %v109_v16 }
0x10e0   :  { %v192_v54 = vmul.f32 1.442695, %v1179_v52 }
0x10e2   :  { %1409 = vpow2.f32 %v192_v54 }
0x10ef   :  { %v1410_v55 = vpop.eup %1409 }
0x10f0   :  { %v200_v56 = vadd.f32 1.0, %v1410_v55 }
0x10f2   :  { %1411 = vlog2.f32 %v200_v56 }
0x10ff   :  { %v1412_v57 = vpop.eup %1411 }
0x1100   :  { %v214_v58 = vmul.f32 0.6931472, %v1412_v57 }
0x1102   :  { %247 = vperm.xlu1 %1335, %v214_v58  }
0x1106   :  { %1336 = vset.pattern.permute.xlu1 %v1472_v9 }
0x110f   :  { %v879_v59 = vpop.xlane.xlu0 %878 }
0x1110   :  { %v880_v60 = vadd.f32 %v879_v59, %v1557_v13 }
0x1112   :  { %884 = vperm.xlu1 %1336, %v880_v60  }
0x1113   :  { %v997_v25 = vpop.permute.xlu0 %996 }
0x1114   :  { %v999_v11 = vsel %vm278_vm1, %v997_v25, 0.0 }
0x117d   :  { %v248_v62 = vpop.permute.xlu1 %247 }
0x117e   :  { %v260_v0 = vmul.f32 %v1607_v30, %v248_v62 }
0x118d   :  { %v1803_v63 = vpop.permute.xlu1 %884 }
0x118e   :  { %v1014_v5 = vmul.f32 %v1803_v63, %v260_v0 }
0x1190   :  { %v1015_v10 = vadd.f32 %v1014_v5, %v121_v6 }
0x1196   :  { %v1087_v14 = vpop.f32.mrf.mxu0 }
0x1197   :  { %v1091_v15 = vadd.f32 %v1087_v14, %v1015_v10 }
0x1198   :  { %v1307_v9 = vpop.f32.mrf.mxu0 }
0x1199   :  { %1413 = vtanh.f32 %v1091_v15  ;;  %v1195_v18 = vmul.f32 -1.442695, %v1091_v15 }
0x119b   :  { %1415 = vpow2.f32 %v1195_v18 }
0x11a6   :  { %v1414_v17 = vpop.eup %1413 }
0x11a7   :  { %1101 = vrot.lane.b32.xlu1 %v1414_v17, %s1475_s14 }
0x11a8   :  { %v1416_v19 = vpop.eup %1415 }
0x11a9   :  { %v1095_v3 = vadd.f32 1.0, %v1416_v19 }
0x11ab   :  { %1417 = vrcp.f32 %v1095_v3 }
0x11b8   :  { %v1418_v27 = vpop.eup %1417 }
0x11b9   :  { %v1099_v21 = vmul.f32 %v1418_v27, %v987_v40 }
0x1219   :  { %v1102_v20 = vpop.permute.xlu1 %1101 }
0x121a   :  { %v1104_v30 = vmul.f32 %v1418_v27, %v1102_v20 }
0x121c   :  { %1106 = vrot.lane.b32.xlu1 %v1104_v30, %s1476_s15 }
0x128e   :  { %v1107_v29 = vpop.permute.xlu1 %1106 }
0x128f   :  { %v1109_v22 = vadd.f32 %v1107_v29, %v1099_v21 }
0x1291   :  { %1419 = vtanh.f32 %v1109_v22 }
0x129e   :  { %v1420_v12 = vpop.eup %1419 }
0x129f   :  { %1112 = vrot.lane.b32.xlu1 %v1420_v12, %s1475_s14 }
0x1311   :  { %v1113_v23 = vpop.permute.xlu1 %1112 }
0x1312   :  { %v1115_v24 = vmul.f32 %v1418_v27, %v1113_v23 }
0x1314   :  { %v1116_v8 = vmul.f32 %v1115_v24, %v1647_v28 }
0x1316   :  { %1118 = vrot.lane.b32.xlu1 %v1116_v8, %s1476_s15 }
0x133a   :  { %1000 = vadd.xlane.f32.xlu1 %v999_v11 }
0x134b   :  { %32 = vrot.lane.b32.xlu1 %v1538_v7, %s1474_s8  ;;  %s1425_s8 = scalar_lea.vmem %s1159_s7, 128 }
0x134c   :  { %p1426_p0 = scmp.ne.s32.totalorder %s1159_s7, %s1425_s8  ;;  %p1431_p2 = scmp.lt.s32.totalorder %s1425_s8, %s1425_s8 }
0x134e   :  { %p1432_p3 = por %p1431_p2, %p1430_p1 }
0x1350   :  { %p1433_p4 = pnand %p1432_p3, %p1426_p0 }
0x1388   :  { %v1119_v26 = vpop.permute.xlu1 %1118 }
0x1389   :  { %v1121_v31 = vsel %vm278_vm1, %v1119_v26, 0.0 }
0x138a   :  { %1122 = vadd.xlane.f32.xlu0 %v1121_v31 }
0x13a0   :  { %38 = vrot.lane.b32.xlu0 %v1538_v7, %s1478_s0  ;;  %v400_v7 = vsel %vm394_vm3, %v1676_v53, %v1181_v39 }
0x13a1   :  { %v521_v40 = vsel %vm515_vm4, %v1716_v44, %v400_v7 }
0x13c3   :  { %v1001_v32 = vpop.xlane.xlu1 %1000 }
0x13c4   :  { %v1002_v34 = vadd.f32 %v1001_v32, %v1557_v13 }
0x13c6   :  { %1006 = vperm.xlu1 %1336, %v1002_v34  }
0x13c7   :  { %v33_v28 = vpop.permute.xlu1 %32 }
0x13c8   :  { %1308 = vpush %v33_v28 }
0x1413   :  { %v1123_v35 = vpop.xlane.xlu0 %1122 }
0x1414   :  { %v1124_v36 = vadd.f32 %v1123_v35, %v1557_v13  ;;  %v643_v13 = vsel %vm637_vm5, %v1756_v33, %v521_v40 }
0x1415   :  { %v765_v1 = vsel %vm759_vm6, %v1786_v4, %v643_v13 }
0x1416   :  { %1128 = vperm.xlu1 %1336, %v1124_v36   ;;  %v887_v2 = vsel %vm881_vm7, %v1803_v63, %v765_v1 }
0x1417   :  { %v39_v37 = vpop.permute.xlu0 %38 }
0x1418   :  { %1310 = vpush %v39_v37 }
0x1441   :  { %v1007_v41 = vpop.permute.xlu1 %1006 }
0x1442   :  { %v1009_v42 = vsel %vm1003_vm8, %v1007_v41, %v887_v2 }
0x1491   :  { %v1129_v43 = vpop.permute.xlu1 %1128 }
0x1492   :  { %v1131_v53 = vsel %vm1125_vm9, %v1129_v43, %v1009_v42 }
0x1493   :  { %1133 = vrot.lane.b32.xlu1 %v1131_v53, %s1469_s20  ;;  %1141 = vst.msk [vmem:[#allocation6] sm:$0xff] %vm1139_vm10, %v1131_v53 }
0x1494   :  { %1436 = shalt.err (!%p1433_p4)
}
0x1495   :  { %1161 = dma.vmem_to_hbm [thread:$0]  %s1159_s7, 128, %s1845_s5, [#allocation7]   ;;  %v30_v44 = vld [vmem:[%s1841_s1] sm:$0xff]  ;;  %vm1136_vm11 = vcmask 7168  }
0x1496   :  { %s1309_s10 = spop %1308  ;;  %s1480_s13 = smov [#allocation4]  }
0x1497   :  { %v35_v33 = vstv %s1309_s10  ;;  %s1311_s20 = spop %1310  ;;  %s1148_s5 = sshll.u32 %s1480_s13, 4  ;;  %s1149_s5 = int_to_ptr.vmem [resolvable:$true] %s1148_s5 }
0x1498   :  { %v37_v4 = vmul.f32 %v35_v33, %v30_v44  ;;  %v41_v45 = vstv %s1311_s20  ;;  %s1445_s1 = scalar_lea.vmem %s1149_s5, 128  ;;  %p1450_p6 = scmp.lt.s32.totalorder %s1149_s5, %s1149_s5 }
0x1499   :  { %p1446_p5 = scmp.ne.s32.totalorder %s1149_s5, %s1445_s1  ;;  %p1451_p7 = scmp.lt.s32.totalorder %s1445_s1, %s1445_s1 }
0x149a   :  { %v43_v46 = vadd.f32 %v41_v45, %v37_v4 }
0x149b   :  { %p1452_p8 = por %p1451_p7, %p1450_p6 }
0x149c   :  { %v1170_v47 = vadd.f32 -1.0, %v43_v46 }
0x149d   :  { %p1453_p9 = pnand %p1452_p8, %p1446_p5 }
0x149e   :  { %v45_v48 = vmul.f32 1.442695, %v1170_v47 }
0x14a0   :  { %1421 = vpow2.f32 %v45_v48 }
0x14ad   :  { %v1422_v49 = vpop.eup %1421 }
0x14ae   :  { %v47_v50 = vadd.f32 1.0, %v1422_v49 }
0x14b0   :  { %1423 = vlog2.f32 %v47_v50 }
0x14bd   :  { %v1424_v51 = vpop.eup %1423 }
0x14be   :  { %v49_v52 = vmul.f32 0.6931472, %v1424_v51 }
0x1505   :  { %v1134_v54 = vpop.permute.xlu1 %1133 }
0x1506   :  { %v1137_v55 = vsel %vm1136_vm11, 1.0, %v1134_v54 }
0x1507   :  { %v1138_v56 = vmul.f32 %v1137_v55, %v49_v52 }
0x1509   :  { %1140 = vst.msk [vmem:[#allocation4] sm:$0xff] %vm1139_vm10, %v1138_v56 }
0x150a   :  { %1456 = shalt.err (!%p1453_p9)
}
0x150b   :  { %1151 = dma.vmem_to_hbm [thread:$0]  %s1149_s5, 128, %s1844_s4, [#allocation5]  }
0x150c   :  { %1465 = dma.done.wait [#allocation5], 128  }
0x150d   :  { %1466 = vsyncadd [#allocation5], 4294967168 }
0x150e   :  { %1467 = dma.done.wait [#allocation7], 128  }
0x150f   :  { %1468 = vsyncadd [#allocation7], 4294967168 }
0x1510   :  { %1168 = vsyncpa [#allocation5], 1 }
0x1511   :  { %1169 = vsyncpa [#allocation7], 1 }

</bundles_post_ra>
